<compile_context>
chip_gen: v6e
topology: v6e:2x2x1
jax: 0.10.0
libtpu: 0.0.40
codegen_flags: <defaults>
</compile_context>

<pallas_src>
import jax
import jax.numpy as jnp
from jax.experimental import pallas as pl
from jax.experimental.pallas import tpu as pltpu

KH = KW = 3  # conv kernel size (fixed by the module)


def _round_up(a, b):
    return ((a + b - 1) // b) * b


def _make_conv_kernel(Cin, Cout, W, HWp):
    """Direct 3x3 valid conv on a flattened (row-major H,W) spatial axis."""

    def kernel(x_ref, w_ref, b_ref, o_ref):
        # x_ref: (1, Cin, L)   VMEM, one image; flat spatial axis zero-padded to L
        # w_ref: (Cout*Cin*KH*KW,) SMEM, PyTorch OIHW order, flattened
        # b_ref: (Cout,)       SMEM
        # o_ref: (1, Cout, HWp)
        x = x_ref[0]  # (Cin, L) float32
        rows = []
        for co in range(Cout):
            acc = jnp.zeros((1, HWp), jnp.float32)
            for ci in range(Cin):
                for kh in range(KH):
                    for kw in range(KW):
                        s = kh * W + kw  # static flat-axis shift of this tap
                        w_s = w_ref[((co * Cin + ci) * KH + kh) * KW + kw]
                        acc = acc + w_s * x[ci:ci + 1, s:s + HWp]
            rows.append(acc + b_ref[co])
        o_ref[0] = jnp.concatenate(rows, axis=0).astype(o_ref.dtype)

    return kernel


def conv2d_3x3_pallas(x_nchw, weight_oihw, bias):
    """nn.Conv2d(Cin, Cout, kernel_size=3) forward: stride 1, no padding."""
    N, Cin, H, W = x_nchw.shape
    Cout = weight_oihw.shape[0]
    Ho, Wo = H - KH + 1, W - KW + 1
    HW = H * W
    HALO = (KH - 1) * W + (KW - 1)          # max tap shift on the flat axis
    HWp = _round_up(HW, 128)                # lane-dense output width
    L = _round_up(HWp + HALO, 128)          # input flat width incl. halo

    # Raw-input-sized reshape + tail pad only (no im2col expansion, no transposes).
    x_flat = jnp.pad(x_nchw.reshape(N, Cin, HW).astype(jnp.float32),
                     ((0, 0), (0, 0), (0, L - HW)))
    w_flat = weight_oihw.reshape(-1).astype(jnp.float32)
    b_flat = bias.astype(jnp.float32)

    kernel = _make_conv_kernel(Cin, Cout, W, HWp)

    out = pl.pallas_call(
        kernel,
        out_shape=jax.ShapeDtypeStruct((N, Cout, HWp), jnp.float32),
        grid=(N,),
        in_specs=[
            pl.BlockSpec((1, Cin, L), lambda n: (n, 0, 0)),
            pl.BlockSpec(memory_space=pltpu.MemorySpace.SMEM),
            pl.BlockSpec(memory_space=pltpu.MemorySpace.SMEM),
        ],
        out_specs=pl.BlockSpec((1, Cout, HWp), lambda n: (n, 0, 0)),
        compiler_params=pltpu.CompilerParams(
            dimension_semantics=("parallel",)),
    )(x_flat, w_flat, b_flat)

    # Drop lane padding, fold flat axis back to (H, W), keep valid conv outputs.
    out = out[:, :, :HW].reshape(N, Cout, H, W)
    return out[:, :, :Ho, :Wo]  # already NCHW


def init_tmodel_params(key):
    """Deterministic init mimicking nn.Conv2d(3, 3, 3) parameter shapes."""
    k_w, k_b = jax.random.split(key)
    fan_in = 3 * KH * KW
    bound = 1.0 / jnp.sqrt(fan_in)
    weight = jax.random.uniform(k_w, (3, 3, KH, KW), jnp.float32, -bound, bound)
    bias = jax.random.uniform(k_b, (3,), jnp.float32, -bound, bound)
    return weight, bias


if __name__ == "__main__":
    key = jax.random.PRNGKey(0)
    k_x, k_p = jax.random.split(key)

    # Small shapes consistent with Conv2d(in_channels=3, ...): NCHW input.
    x = jax.random.normal(k_x, (2, 3, 16, 16), jnp.float32)
    weight, bias = init_tmodel_params(k_p)

    out = jax.block_until_ready(conv2d_3x3_pallas(x, weight, bias))
    assert out.shape == (2, 3, 14, 14), out.shape

    # Cross-check against XLA's native convolution.
    ref = jax.lax.conv_general_dilated(
        x, weight, window_strides=(1, 1), padding="VALID",
        dimension_numbers=("NCHW", "OIHW", "NCHW"),
    ) + bias.reshape(1, 3, 1, 1)
    assert jnp.allclose(out, ref, rtol=1e-4, atol=1e-4), "mismatch vs reference conv"

    print("KERNEL_OK")
</pallas_src>

<mosaic_0001>
module attributes {stable_mosaic.version = 11 : i64} {
  func.func @kernel(%arg0: i32, %arg1: memref<1x3x384xf32, #tpu.memory_space<vmem>>, %arg2: memref<81xf32, #tpu.memory_space<smem>>, %arg3: memref<3xf32, #tpu.memory_space<smem>>, %arg4: memref<1x3x256xf32, #tpu.memory_space<vmem>>) attributes {dimension_semantics = [#tpu.dimension_semantics<parallel>], iteration_bounds = array<i64: 2>, scalar_prefetch = 0 : i64, scratch_operands = 0 : i64, tpu.core_type = #tpu.core_type<tc>, window_params = [{transform_indices = @transform_0, window_bounds = array<i64: 1, 3, 384>}, {transform_indices = @transform_1, window_bounds = array<i64: 81>}, {transform_indices = @transform_2, window_bounds = array<i64: 3>}, {transform_indices = @transform_3, window_bounds = array<i64: 1, 3, 256>}]} {
    %c0 = arith.constant 0 : index
    %c0_0 = arith.constant 0 : index
    %c0_1 = arith.constant 0 : index
    %0 = vector.load %arg1[%c0, %c0_0, %c0_1] : memref<1x3x384xf32, #tpu.memory_space<vmem>>, vector<1x3x384xf32>
    %1 = vector.shape_cast %0 : vector<1x3x384xf32> to vector<3x384xf32>
    %cst = arith.constant 0.000000e+00 : f32
    %2 = vector.broadcast %cst : f32 to vector<1x256xf32>
    %c0_2 = arith.constant 0 : index
    %3 = memref.load %arg2[%c0_2] : memref<81xf32, #tpu.memory_space<smem>>
    %4 = vector.extract_strided_slice %1 {offsets = [0, 0], sizes = [1, 256], strides = [1, 1]} : vector<3x384xf32> to vector<1x256xf32>
    %5 = vector.broadcast %3 : f32 to vector<1x256xf32>
    %6 = arith.mulf %5, %4 : vector<1x256xf32>
    %7 = arith.addf %2, %6 : vector<1x256xf32>
    %c1 = arith.constant 1 : index
    %8 = memref.load %arg2[%c1] : memref<81xf32, #tpu.memory_space<smem>>
    %9 = vector.extract_strided_slice %1 {offsets = [0, 1], sizes = [1, 256], strides = [1, 1]} : vector<3x384xf32> to vector<1x256xf32>
    %10 = vector.broadcast %8 : f32 to vector<1x256xf32>
    %11 = arith.mulf %10, %9 : vector<1x256xf32>
    %12 = arith.addf %7, %11 : vector<1x256xf32>
    %c2 = arith.constant 2 : index
    %13 = memref.load %arg2[%c2] : memref<81xf32, #tpu.memory_space<smem>>
    %14 = vector.extract_strided_slice %1 {offsets = [0, 2], sizes = [1, 256], strides = [1, 1]} : vector<3x384xf32> to vector<1x256xf32>
    %15 = vector.broadcast %13 : f32 to vector<1x256xf32>
    %16 = arith.mulf %15, %14 : vector<1x256xf32>
    %17 = arith.addf %12, %16 : vector<1x256xf32>
    %c3 = arith.constant 3 : index
    %18 = memref.load %arg2[%c3] : memref<81xf32, #tpu.memory_space<smem>>
    %19 = vector.extract_strided_slice %1 {offsets = [0, 16], sizes = [1, 256], strides = [1, 1]} : vector<3x384xf32> to vector<1x256xf32>
    %20 = vector.broadcast %18 : f32 to vector<1x256xf32>
    %21 = arith.mulf %20, %19 : vector<1x256xf32>
    %22 = arith.addf %17, %21 : vector<1x256xf32>
    %c4 = arith.constant 4 : index
    %23 = memref.load %arg2[%c4] : memref<81xf32, #tpu.memory_space<smem>>
    %24 = vector.extract_strided_slice %1 {offsets = [0, 17], sizes = [1, 256], strides = [1, 1]} : vector<3x384xf32> to vector<1x256xf32>
    %25 = vector.broadcast %23 : f32 to vector<1x256xf32>
    %26 = arith.mulf %25, %24 : vector<1x256xf32>
    %27 = arith.addf %22, %26 : vector<1x256xf32>
    %c5 = arith.constant 5 : index
    %28 = memref.load %arg2[%c5] : memref<81xf32, #tpu.memory_space<smem>>
    %29 = vector.extract_strided_slice %1 {offsets = [0, 18], sizes = [1, 256], strides = [1, 1]} : vector<3x384xf32> to vector<1x256xf32>
    %30 = vector.broadcast %28 : f32 to vector<1x256xf32>
    %31 = arith.mulf %30, %29 : vector<1x256xf32>
    %32 = arith.addf %27, %31 : vector<1x256xf32>
    %c6 = arith.constant 6 : index
    %33 = memref.load %arg2[%c6] : memref<81xf32, #tpu.memory_space<smem>>
    %34 = vector.extract_strided_slice %1 {offsets = [0, 32], sizes = [1, 256], strides = [1, 1]} : vector<3x384xf32> to vector<1x256xf32>
    %35 = vector.broadcast %33 : f32 to vector<1x256xf32>
    %36 = arith.mulf %35, %34 : vector<1x256xf32>
    %37 = arith.addf %32, %36 : vector<1x256xf32>
    %c7 = arith.constant 7 : index
    %38 = memref.load %arg2[%c7] : memref<81xf32, #tpu.memory_space<smem>>
    %39 = vector.extract_strided_slice %1 {offsets = [0, 33], sizes = [1, 256], strides = [1, 1]} : vector<3x384xf32> to vector<1x256xf32>
    %40 = vector.broadcast %38 : f32 to vector<1x256xf32>
    %41 = arith.mulf %40, %39 : vector<1x256xf32>
    %42 = arith.addf %37, %41 : vector<1x256xf32>
    %c8 = arith.constant 8 : index
    %43 = memref.load %arg2[%c8] : memref<81xf32, #tpu.memory_space<smem>>
    %44 = vector.extract_strided_slice %1 {offsets = [0, 34], sizes = [1, 256], strides = [1, 1]} : vector<3x384xf32> to vector<1x256xf32>
    %45 = vector.broadcast %43 : f32 to vector<1x256xf32>
    %46 = arith.mulf %45, %44 : vector<1x256xf32>
    %47 = arith.addf %42, %46 : vector<1x256xf32>
    %c9 = arith.constant 9 : index
    %48 = memref.load %arg2[%c9] : memref<81xf32, #tpu.memory_space<smem>>
    %49 = vector.extract_strided_slice %1 {offsets = [1, 0], sizes = [1, 256], strides = [1, 1]} : vector<3x384xf32> to vector<1x256xf32>
    %50 = vector.broadcast %48 : f32 to vector<1x256xf32>
    %51 = arith.mulf %50, %49 : vector<1x256xf32>
    %52 = arith.addf %47, %51 : vector<1x256xf32>
    %c10 = arith.constant 10 : index
    %53 = memref.load %arg2[%c10] : memref<81xf32, #tpu.memory_space<smem>>
    %54 = vector.extract_strided_slice %1 {offsets = [1, 1], sizes = [1, 256], strides = [1, 1]} : vector<3x384xf32> to vector<1x256xf32>
    %55 = vector.broadcast %53 : f32 to vector<1x256xf32>
    %56 = arith.mulf %55, %54 : vector<1x256xf32>
    %57 = arith.addf %52, %56 : vector<1x256xf32>
    %c11 = arith.constant 11 : index
    %58 = memref.load %arg2[%c11] : memref<81xf32, #tpu.memory_space<smem>>
    %59 = vector.extract_strided_slice %1 {offsets = [1, 2], sizes = [1, 256], strides = [1, 1]} : vector<3x384xf32> to vector<1x256xf32>
    %60 = vector.broadcast %58 : f32 to vector<1x256xf32>
    %61 = arith.mulf %60, %59 : vector<1x256xf32>
    %62 = arith.addf %57, %61 : vector<1x256xf32>
    %c12 = arith.constant 12 : index
    %63 = memref.load %arg2[%c12] : memref<81xf32, #tpu.memory_space<smem>>
    %64 = vector.extract_strided_slice %1 {offsets = [1, 16], sizes = [1, 256], strides = [1, 1]} : vector<3x384xf32> to vector<1x256xf32>
    %65 = vector.broadcast %63 : f32 to vector<1x256xf32>
    %66 = arith.mulf %65, %64 : vector<1x256xf32>
    %67 = arith.addf %62, %66 : vector<1x256xf32>
    %c13 = arith.constant 13 : index
    %68 = memref.load %arg2[%c13] : memref<81xf32, #tpu.memory_space<smem>>
    %69 = vector.extract_strided_slice %1 {offsets = [1, 17], sizes = [1, 256], strides = [1, 1]} : vector<3x384xf32> to vector<1x256xf32>
    %70 = vector.broadcast %68 : f32 to vector<1x256xf32>
    %71 = arith.mulf %70, %69 : vector<1x256xf32>
    %72 = arith.addf %67, %71 : vector<1x256xf32>
    %c14 = arith.constant 14 : index
    %73 = memref.load %arg2[%c14] : memref<81xf32, #tpu.memory_space<smem>>
    %74 = vector.extract_strided_slice %1 {offsets = [1, 18], sizes = [1, 256], strides = [1, 1]} : vector<3x384xf32> to vector<1x256xf32>
    %75 = vector.broadcast %73 : f32 to vector<1x256xf32>
    %76 = arith.mulf %75, %74 : vector<1x256xf32>
    %77 = arith.addf %72, %76 : vector<1x256xf32>
    %c15 = arith.constant 15 : index
    %78 = memref.load %arg2[%c15] : memref<81xf32, #tpu.memory_space<smem>>
    %79 = vector.extract_strided_slice %1 {offsets = [1, 32], sizes = [1, 256], strides = [1, 1]} : vector<3x384xf32> to vector<1x256xf32>
    %80 = vector.broadcast %78 : f32 to vector<1x256xf32>
    %81 = arith.mulf %80, %79 : vector<1x256xf32>
    %82 = arith.addf %77, %81 : vector<1x256xf32>
    %c16 = arith.constant 16 : index
    %83 = memref.load %arg2[%c16] : memref<81xf32, #tpu.memory_space<smem>>
    %84 = vector.extract_strided_slice %1 {offsets = [1, 33], sizes = [1, 256], strides = [1, 1]} : vector<3x384xf32> to vector<1x256xf32>
    %85 = vector.broadcast %83 : f32 to vector<1x256xf32>
    %86 = arith.mulf %85, %84 : vector<1x256xf32>
    %87 = arith.addf %82, %86 : vector<1x256xf32>
    %c17 = arith.constant 17 : index
    %88 = memref.load %arg2[%c17] : memref<81xf32, #tpu.memory_space<smem>>
    %89 = vector.extract_strided_slice %1 {offsets = [1, 34], sizes = [1, 256], strides = [1, 1]} : vector<3x384xf32> to vector<1x256xf32>
    %90 = vector.broadcast %88 : f32 to vector<1x256xf32>
    %91 = arith.mulf %90, %89 : vector<1x256xf32>
    %92 = arith.addf %87, %91 : vector<1x256xf32>
    %c18 = arith.constant 18 : index
    %93 = memref.load %arg2[%c18] : memref<81xf32, #tpu.memory_space<smem>>
    %94 = vector.extract_strided_slice %1 {offsets = [2, 0], sizes = [1, 256], strides = [1, 1]} : vector<3x384xf32> to vector<1x256xf32>
    %95 = vector.broadcast %93 : f32 to vector<1x256xf32>
    %96 = arith.mulf %95, %94 : vector<1x256xf32>
    %97 = arith.addf %92, %96 : vector<1x256xf32>
    %c19 = arith.constant 19 : index
    %98 = memref.load %arg2[%c19] : memref<81xf32, #tpu.memory_space<smem>>
    %99 = vector.extract_strided_slice %1 {offsets = [2, 1], sizes = [1, 256], strides = [1, 1]} : vector<3x384xf32> to vector<1x256xf32>
    %100 = vector.broadcast %98 : f32 to vector<1x256xf32>
    %101 = arith.mulf %100, %99 : vector<1x256xf32>
    %102 = arith.addf %97, %101 : vector<1x256xf32>
    %c20 = arith.constant 20 : index
    %103 = memref.load %arg2[%c20] : memref<81xf32, #tpu.memory_space<smem>>
    %104 = vector.extract_strided_slice %1 {offsets = [2, 2], sizes = [1, 256], strides = [1, 1]} : vector<3x384xf32> to vector<1x256xf32>
    %105 = vector.broadcast %103 : f32 to vector<1x256xf32>
    %106 = arith.mulf %105, %104 : vector<1x256xf32>
    %107 = arith.addf %102, %106 : vector<1x256xf32>
    %c21 = arith.constant 21 : index
    %108 = memref.load %arg2[%c21] : memref<81xf32, #tpu.memory_space<smem>>
    %109 = vector.extract_strided_slice %1 {offsets = [2, 16], sizes = [1, 256], strides = [1, 1]} : vector<3x384xf32> to vector<1x256xf32>
    %110 = vector.broadcast %108 : f32 to vector<1x256xf32>
    %111 = arith.mulf %110, %109 : vector<1x256xf32>
    %112 = arith.addf %107, %111 : vector<1x256xf32>
    %c22 = arith.constant 22 : index
    %113 = memref.load %arg2[%c22] : memref<81xf32, #tpu.memory_space<smem>>
    %114 = vector.extract_strided_slice %1 {offsets = [2, 17], sizes = [1, 256], strides = [1, 1]} : vector<3x384xf32> to vector<1x256xf32>
    %115 = vector.broadcast %113 : f32 to vector<1x256xf32>
    %116 = arith.mulf %115, %114 : vector<1x256xf32>
    %117 = arith.addf %112, %116 : vector<1x256xf32>
    %c23 = arith.constant 23 : index
    %118 = memref.load %arg2[%c23] : memref<81xf32, #tpu.memory_space<smem>>
    %119 = vector.extract_strided_slice %1 {offsets = [2, 18], sizes = [1, 256], strides = [1, 1]} : vector<3x384xf32> to vector<1x256xf32>
    %120 = vector.broadcast %118 : f32 to vector<1x256xf32>
    %121 = arith.mulf %120, %119 : vector<1x256xf32>
    %122 = arith.addf %117, %121 : vector<1x256xf32>
    %c24 = arith.constant 24 : index
    %123 = memref.load %arg2[%c24] : memref<81xf32, #tpu.memory_space<smem>>
    %124 = vector.extract_strided_slice %1 {offsets = [2, 32], sizes = [1, 256], strides = [1, 1]} : vector<3x384xf32> to vector<1x256xf32>
    %125 = vector.broadcast %123 : f32 to vector<1x256xf32>
    %126 = arith.mulf %125, %124 : vector<1x256xf32>
    %127 = arith.addf %122, %126 : vector<1x256xf32>
    %c25 = arith.constant 25 : index
    %128 = memref.load %arg2[%c25] : memref<81xf32, #tpu.memory_space<smem>>
    %129 = vector.extract_strided_slice %1 {offsets = [2, 33], sizes = [1, 256], strides = [1, 1]} : vector<3x384xf32> to vector<1x256xf32>
    %130 = vector.broadcast %128 : f32 to vector<1x256xf32>
    %131 = arith.mulf %130, %129 : vector<1x256xf32>
    %132 = arith.addf %127, %131 : vector<1x256xf32>
    %c26 = arith.constant 26 : index
    %133 = memref.load %arg2[%c26] : memref<81xf32, #tpu.memory_space<smem>>
    %134 = vector.extract_strided_slice %1 {offsets = [2, 34], sizes = [1, 256], strides = [1, 1]} : vector<3x384xf32> to vector<1x256xf32>
    %135 = vector.broadcast %133 : f32 to vector<1x256xf32>
    %136 = arith.mulf %135, %134 : vector<1x256xf32>
    %137 = arith.addf %132, %136 : vector<1x256xf32>
    %c0_3 = arith.constant 0 : index
    %138 = memref.load %arg3[%c0_3] : memref<3xf32, #tpu.memory_space<smem>>
    %139 = vector.broadcast %138 : f32 to vector<1x256xf32>
    %140 = arith.addf %137, %139 : vector<1x256xf32>
    %cst_4 = arith.constant 0.000000e+00 : f32
    %141 = vector.broadcast %cst_4 : f32 to vector<1x256xf32>
    %c27 = arith.constant 27 : index
    %142 = memref.load %arg2[%c27] : memref<81xf32, #tpu.memory_space<smem>>
    %143 = vector.extract_strided_slice %1 {offsets = [0, 0], sizes = [1, 256], strides = [1, 1]} : vector<3x384xf32> to vector<1x256xf32>
    %144 = vector.broadcast %142 : f32 to vector<1x256xf32>
    %145 = arith.mulf %144, %143 : vector<1x256xf32>
    %146 = arith.addf %141, %145 : vector<1x256xf32>
    %c28 = arith.constant 28 : index
    %147 = memref.load %arg2[%c28] : memref<81xf32, #tpu.memory_space<smem>>
    %148 = vector.extract_strided_slice %1 {offsets = [0, 1], sizes = [1, 256], strides = [1, 1]} : vector<3x384xf32> to vector<1x256xf32>
    %149 = vector.broadcast %147 : f32 to vector<1x256xf32>
    %150 = arith.mulf %149, %148 : vector<1x256xf32>
    %151 = arith.addf %146, %150 : vector<1x256xf32>
    %c29 = arith.constant 29 : index
    %152 = memref.load %arg2[%c29] : memref<81xf32, #tpu.memory_space<smem>>
    %153 = vector.extract_strided_slice %1 {offsets = [0, 2], sizes = [1, 256], strides = [1, 1]} : vector<3x384xf32> to vector<1x256xf32>
    %154 = vector.broadcast %152 : f32 to vector<1x256xf32>
    %155 = arith.mulf %154, %153 : vector<1x256xf32>
    %156 = arith.addf %151, %155 : vector<1x256xf32>
    %c30 = arith.constant 30 : index
    %157 = memref.load %arg2[%c30] : memref<81xf32, #tpu.memory_space<smem>>
    %158 = vector.extract_strided_slice %1 {offsets = [0, 16], sizes = [1, 256], strides = [1, 1]} : vector<3x384xf32> to vector<1x256xf32>
    %159 = vector.broadcast %157 : f32 to vector<1x256xf32>
    %160 = arith.mulf %159, %158 : vector<1x256xf32>
    %161 = arith.addf %156, %160 : vector<1x256xf32>
    %c31 = arith.constant 31 : index
    %162 = memref.load %arg2[%c31] : memref<81xf32, #tpu.memory_space<smem>>
    %163 = vector.extract_strided_slice %1 {offsets = [0, 17], sizes = [1, 256], strides = [1, 1]} : vector<3x384xf32> to vector<1x256xf32>
    %164 = vector.broadcast %162 : f32 to vector<1x256xf32>
    %165 = arith.mulf %164, %163 : vector<1x256xf32>
    %166 = arith.addf %161, %165 : vector<1x256xf32>
    %c32 = arith.constant 32 : index
    %167 = memref.load %arg2[%c32] : memref<81xf32, #tpu.memory_space<smem>>
    %168 = vector.extract_strided_slice %1 {offsets = [0, 18], sizes = [1, 256], strides = [1, 1]} : vector<3x384xf32> to vector<1x256xf32>
    %169 = vector.broadcast %167 : f32 to vector<1x256xf32>
    %170 = arith.mulf %169, %168 : vector<1x256xf32>
    %171 = arith.addf %166, %170 : vector<1x256xf32>
    %c33 = arith.constant 33 : index
    %172 = memref.load %arg2[%c33] : memref<81xf32, #tpu.memory_space<smem>>
    %173 = vector.extract_strided_slice %1 {offsets = [0, 32], sizes = [1, 256], strides = [1, 1]} : vector<3x384xf32> to vector<1x256xf32>
    %174 = vector.broadcast %172 : f32 to vector<1x256xf32>
    %175 = arith.mulf %174, %173 : vector<1x256xf32>
    %176 = arith.addf %171, %175 : vector<1x256xf32>
    %c34 = arith.constant 34 : index
    %177 = memref.load %arg2[%c34] : memref<81xf32, #tpu.memory_space<smem>>
    %178 = vector.extract_strided_slice %1 {offsets = [0, 33], sizes = [1, 256], strides = [1, 1]} : vector<3x384xf32> to vector<1x256xf32>
    %179 = vector.broadcast %177 : f32 to vector<1x256xf32>
    %180 = arith.mulf %179, %178 : vector<1x256xf32>
    %181 = arith.addf %176, %180 : vector<1x256xf32>
    %c35 = arith.constant 35 : index
    %182 = memref.load %arg2[%c35] : memref<81xf32, #tpu.memory_space<smem>>
    %183 = vector.extract_strided_slice %1 {offsets = [0, 34], sizes = [1, 256], strides = [1, 1]} : vector<3x384xf32> to vector<1x256xf32>
    %184 = vector.broadcast %182 : f32 to vector<1x256xf32>
    %185 = arith.mulf %184, %183 : vector<1x256xf32>
    %186 = arith.addf %181, %185 : vector<1x256xf32>
    %c36 = arith.constant 36 : index
    %187 = memref.load %arg2[%c36] : memref<81xf32, #tpu.memory_space<smem>>
    %188 = vector.extract_strided_slice %1 {offsets = [1, 0], sizes = [1, 256], strides = [1, 1]} : vector<3x384xf32> to vector<1x256xf32>
    %189 = vector.broadcast %187 : f32 to vector<1x256xf32>
    %190 = arith.mulf %189, %188 : vector<1x256xf32>
    %191 = arith.addf %186, %190 : vector<1x256xf32>
    %c37 = arith.constant 37 : index
    %192 = memref.load %arg2[%c37] : memref<81xf32, #tpu.memory_space<smem>>
    %193 = vector.extract_strided_slice %1 {offsets = [1, 1], sizes = [1, 256], strides = [1, 1]} : vector<3x384xf32> to vector<1x256xf32>
    %194 = vector.broadcast %192 : f32 to vector<1x256xf32>
    %195 = arith.mulf %194, %193 : vector<1x256xf32>
    %196 = arith.addf %191, %195 : vector<1x256xf32>
    %c38 = arith.constant 38 : index
    %197 = memref.load %arg2[%c38] : memref<81xf32, #tpu.memory_space<smem>>
    %198 = vector.extract_strided_slice %1 {offsets = [1, 2], sizes = [1, 256], strides = [1, 1]} : vector<3x384xf32> to vector<1x256xf32>
    %199 = vector.broadcast %197 : f32 to vector<1x256xf32>
    %200 = arith.mulf %199, %198 : vector<1x256xf32>
    %201 = arith.addf %196, %200 : vector<1x256xf32>
    %c39 = arith.constant 39 : index
    %202 = memref.load %arg2[%c39] : memref<81xf32, #tpu.memory_space<smem>>
    %203 = vector.extract_strided_slice %1 {offsets = [1, 16], sizes = [1, 256], strides = [1, 1]} : vector<3x384xf32> to vector<1x256xf32>
    %204 = vector.broadcast %202 : f32 to vector<1x256xf32>
    %205 = arith.mulf %204, %203 : vector<1x256xf32>
    %206 = arith.addf %201, %205 : vector<1x256xf32>
    %c40 = arith.constant 40 : index
    %207 = memref.load %arg2[%c40] : memref<81xf32, #tpu.memory_space<smem>>
    %208 = vector.extract_strided_slice %1 {offsets = [1, 17], sizes = [1, 256], strides = [1, 1]} : vector<3x384xf32> to vector<1x256xf32>
    %209 = vector.broadcast %207 : f32 to vector<1x256xf32>
    %210 = arith.mulf %209, %208 : vector<1x256xf32>
    %211 = arith.addf %206, %210 : vector<1x256xf32>
    %c41 = arith.constant 41 : index
    %212 = memref.load %arg2[%c41] : memref<81xf32, #tpu.memory_space<smem>>
    %213 = vector.extract_strided_slice %1 {offsets = [1, 18], sizes = [1, 256], strides = [1, 1]} : vector<3x384xf32> to vector<1x256xf32>
    %214 = vector.broadcast %212 : f32 to vector<1x256xf32>
    %215 = arith.mulf %214, %213 : vector<1x256xf32>
    %216 = arith.addf %211, %215 : vector<1x256xf32>
    %c42 = arith.constant 42 : index
    %217 = memref.load %arg2[%c42] : memref<81xf32, #tpu.memory_space<smem>>
    %218 = vector.extract_strided_slice %1 {offsets = [1, 32], sizes = [1, 256], strides = [1, 1]} : vector<3x384xf32> to vector<1x256xf32>
    %219 = vector.broadcast %217 : f32 to vector<1x256xf32>
    %220 = arith.mulf %219, %218 : vector<1x256xf32>
    %221 = arith.addf %216, %220 : vector<1x256xf32>
    %c43 = arith.constant 43 : index
    %222 = memref.load %arg2[%c43] : memref<81xf32, #tpu.memory_space<smem>>
    %223 = vector.extract_strided_slice %1 {offsets = [1, 33], sizes = [1, 256], strides = [1, 1]} : vector<3x384xf32> to vector<1x256xf32>
    %224 = vector.broadcast %222 : f32 to vector<1x256xf32>
    %225 = arith.mulf %224, %223 : vector<1x256xf32>
    %226 = arith.addf %221, %225 : vector<1x256xf32>
    %c44 = arith.constant 44 : index
    %227 = memref.load %arg2[%c44] : memref<81xf32, #tpu.memory_space<smem>>
    %228 = vector.extract_strided_slice %1 {offsets = [1, 34], sizes = [1, 256], strides = [1, 1]} : vector<3x384xf32> to vector<1x256xf32>
    %229 = vector.broadcast %227 : f32 to vector<1x256xf32>
    %230 = arith.mulf %229, %228 : vector<1x256xf32>
    %231 = arith.addf %226, %230 : vector<1x256xf32>
    %c45 = arith.constant 45 : index
    %232 = memref.load %arg2[%c45] : memref<81xf32, #tpu.memory_space<smem>>
    %233 = vector.extract_strided_slice %1 {offsets = [2, 0], sizes = [1, 256], strides = [1, 1]} : vector<3x384xf32> to vector<1x256xf32>
    %234 = vector.broadcast %232 : f32 to vector<1x256xf32>
    %235 = arith.mulf %234, %233 : vector<1x256xf32>
    %236 = arith.addf %231, %235 : vector<1x256xf32>
    %c46 = arith.constant 46 : index
    %237 = memref.load %arg2[%c46] : memref<81xf32, #tpu.memory_space<smem>>
    %238 = vector.extract_strided_slice %1 {offsets = [2, 1], sizes = [1, 256], strides = [1, 1]} : vector<3x384xf32> to vector<1x256xf32>
    %239 = vector.broadcast %237 : f32 to vector<1x256xf32>
    %240 = arith.mulf %239, %238 : vector<1x256xf32>
    %241 = arith.addf %236, %240 : vector<1x256xf32>
    %c47 = arith.constant 47 : index
    %242 = memref.load %arg2[%c47] : memref<81xf32, #tpu.memory_space<smem>>
    %243 = vector.extract_strided_slice %1 {offsets = [2, 2], sizes = [1, 256], strides = [1, 1]} : vector<3x384xf32> to vector<1x256xf32>
    %244 = vector.broadcast %242 : f32 to vector<1x256xf32>
    %245 = arith.mulf %244, %243 : vector<1x256xf32>
    %246 = arith.addf %241, %245 : vector<1x256xf32>
    %c48 = arith.constant 48 : index
    %247 = memref.load %arg2[%c48] : memref<81xf32, #tpu.memory_space<smem>>
    %248 = vector.extract_strided_slice %1 {offsets = [2, 16], sizes = [1, 256], strides = [1, 1]} : vector<3x384xf32> to vector<1x256xf32>
    %249 = vector.broadcast %247 : f32 to vector<1x256xf32>
    %250 = arith.mulf %249, %248 : vector<1x256xf32>
    %251 = arith.addf %246, %250 : vector<1x256xf32>
    %c49 = arith.constant 49 : index
    %252 = memref.load %arg2[%c49] : memref<81xf32, #tpu.memory_space<smem>>
    %253 = vector.extract_strided_slice %1 {offsets = [2, 17], sizes = [1, 256], strides = [1, 1]} : vector<3x384xf32> to vector<1x256xf32>
    %254 = vector.broadcast %252 : f32 to vector<1x256xf32>
    %255 = arith.mulf %254, %253 : vector<1x256xf32>
    %256 = arith.addf %251, %255 : vector<1x256xf32>
    %c50 = arith.constant 50 : index
    %257 = memref.load %arg2[%c50] : memref<81xf32, #tpu.memory_space<smem>>
    %258 = vector.extract_strided_slice %1 {offsets = [2, 18], sizes = [1, 256], strides = [1, 1]} : vector<3x384xf32> to vector<1x256xf32>
    %259 = vector.broadcast %257 : f32 to vector<1x256xf32>
    %260 = arith.mulf %259, %258 : vector<1x256xf32>
    %261 = arith.addf %256, %260 : vector<1x256xf32>
    %c51 = arith.constant 51 : index
    %262 = memref.load %arg2[%c51] : memref<81xf32, #tpu.memory_space<smem>>
    %263 = vector.extract_strided_slice %1 {offsets = [2, 32], sizes = [1, 256], strides = [1, 1]} : vector<3x384xf32> to vector<1x256xf32>
    %264 = vector.broadcast %262 : f32 to vector<1x256xf32>
    %265 = arith.mulf %264, %263 : vector<1x256xf32>
    %266 = arith.addf %261, %265 : vector<1x256xf32>
    %c52 = arith.constant 52 : index
    %267 = memref.load %arg2[%c52] : memref<81xf32, #tpu.memory_space<smem>>
    %268 = vector.extract_strided_slice %1 {offsets = [2, 33], sizes = [1, 256], strides = [1, 1]} : vector<3x384xf32> to vector<1x256xf32>
    %269 = vector.broadcast %267 : f32 to vector<1x256xf32>
    %270 = arith.mulf %269, %268 : vector<1x256xf32>
    %271 = arith.addf %266, %270 : vector<1x256xf32>
    %c53 = arith.constant 53 : index
    %272 = memref.load %arg2[%c53] : memref<81xf32, #tpu.memory_space<smem>>
    %273 = vector.extract_strided_slice %1 {offsets = [2, 34], sizes = [1, 256], strides = [1, 1]} : vector<3x384xf32> to vector<1x256xf32>
    %274 = vector.broadcast %272 : f32 to vector<1x256xf32>
    %275 = arith.mulf %274, %273 : vector<1x256xf32>
    %276 = arith.addf %271, %275 : vector<1x256xf32>
    %c1_5 = arith.constant 1 : index
    %277 = memref.load %arg3[%c1_5] : memref<3xf32, #tpu.memory_space<smem>>
    %278 = vector.broadcast %277 : f32 to vector<1x256xf32>
    %279 = arith.addf %276, %278 : vector<1x256xf32>
    %cst_6 = arith.constant 0.000000e+00 : f32
    %280 = vector.broadcast %cst_6 : f32 to vector<1x256xf32>
    %c54 = arith.constant 54 : index
    %281 = memref.load %arg2[%c54] : memref<81xf32, #tpu.memory_space<smem>>
    %282 = vector.extract_strided_slice %1 {offsets = [0, 0], sizes = [1, 256], strides = [1, 1]} : vector<3x384xf32> to vector<1x256xf32>
    %283 = vector.broadcast %281 : f32 to vector<1x256xf32>
    %284 = arith.mulf %283, %282 : vector<1x256xf32>
    %285 = arith.addf %280, %284 : vector<1x256xf32>
    %c55 = arith.constant 55 : index
    %286 = memref.load %arg2[%c55] : memref<81xf32, #tpu.memory_space<smem>>
    %287 = vector.extract_strided_slice %1 {offsets = [0, 1], sizes = [1, 256], strides = [1, 1]} : vector<3x384xf32> to vector<1x256xf32>
    %288 = vector.broadcast %286 : f32 to vector<1x256xf32>
    %289 = arith.mulf %288, %287 : vector<1x256xf32>
    %290 = arith.addf %285, %289 : vector<1x256xf32>
    %c56 = arith.constant 56 : index
    %291 = memref.load %arg2[%c56] : memref<81xf32, #tpu.memory_space<smem>>
    %292 = vector.extract_strided_slice %1 {offsets = [0, 2], sizes = [1, 256], strides = [1, 1]} : vector<3x384xf32> to vector<1x256xf32>
    %293 = vector.broadcast %291 : f32 to vector<1x256xf32>
    %294 = arith.mulf %293, %292 : vector<1x256xf32>
    %295 = arith.addf %290, %294 : vector<1x256xf32>
    %c57 = arith.constant 57 : index
    %296 = memref.load %arg2[%c57] : memref<81xf32, #tpu.memory_space<smem>>
    %297 = vector.extract_strided_slice %1 {offsets = [0, 16], sizes = [1, 256], strides = [1, 1]} : vector<3x384xf32> to vector<1x256xf32>
    %298 = vector.broadcast %296 : f32 to vector<1x256xf32>
    %299 = arith.mulf %298, %297 : vector<1x256xf32>
    %300 = arith.addf %295, %299 : vector<1x256xf32>
    %c58 = arith.constant 58 : index
    %301 = memref.load %arg2[%c58] : memref<81xf32, #tpu.memory_space<smem>>
    %302 = vector.extract_strided_slice %1 {offsets = [0, 17], sizes = [1, 256], strides = [1, 1]} : vector<3x384xf32> to vector<1x256xf32>
    %303 = vector.broadcast %301 : f32 to vector<1x256xf32>
    %304 = arith.mulf %303, %302 : vector<1x256xf32>
    %305 = arith.addf %300, %304 : vector<1x256xf32>
    %c59 = arith.constant 59 : index
    %306 = memref.load %arg2[%c59] : memref<81xf32, #tpu.memory_space<smem>>
    %307 = vector.extract_strided_slice %1 {offsets = [0, 18], sizes = [1, 256], strides = [1, 1]} : vector<3x384xf32> to vector<1x256xf32>
    %308 = vector.broadcast %306 : f32 to vector<1x256xf32>
    %309 = arith.mulf %308, %307 : vector<1x256xf32>
    %310 = arith.addf %305, %309 : vector<1x256xf32>
    %c60 = arith.constant 60 : index
    %311 = memref.load %arg2[%c60] : memref<81xf32, #tpu.memory_space<smem>>
    %312 = vector.extract_strided_slice %1 {offsets = [0, 32], sizes = [1, 256], strides = [1, 1]} : vector<3x384xf32> to vector<1x256xf32>
    %313 = vector.broadcast %311 : f32 to vector<1x256xf32>
    %314 = arith.mulf %313, %312 : vector<1x256xf32>
    %315 = arith.addf %310, %314 : vector<1x256xf32>
    %c61 = arith.constant 61 : index
    %316 = memref.load %arg2[%c61] : memref<81xf32, #tpu.memory_space<smem>>
    %317 = vector.extract_strided_slice %1 {offsets = [0, 33], sizes = [1, 256], strides = [1, 1]} : vector<3x384xf32> to vector<1x256xf32>
    %318 = vector.broadcast %316 : f32 to vector<1x256xf32>
    %319 = arith.mulf %318, %317 : vector<1x256xf32>
    %320 = arith.addf %315, %319 : vector<1x256xf32>
    %c62 = arith.constant 62 : index
    %321 = memref.load %arg2[%c62] : memref<81xf32, #tpu.memory_space<smem>>
    %322 = vector.extract_strided_slice %1 {offsets = [0, 34], sizes = [1, 256], strides = [1, 1]} : vector<3x384xf32> to vector<1x256xf32>
    %323 = vector.broadcast %321 : f32 to vector<1x256xf32>
    %324 = arith.mulf %323, %322 : vector<1x256xf32>
    %325 = arith.addf %320, %324 : vector<1x256xf32>
    %c63 = arith.constant 63 : index
    %326 = memref.load %arg2[%c63] : memref<81xf32, #tpu.memory_space<smem>>
    %327 = vector.extract_strided_slice %1 {offsets = [1, 0], sizes = [1, 256], strides = [1, 1]} : vector<3x384xf32> to vector<1x256xf32>
    %328 = vector.broadcast %326 : f32 to vector<1x256xf32>
    %329 = arith.mulf %328, %327 : vector<1x256xf32>
    %330 = arith.addf %325, %329 : vector<1x256xf32>
    %c64 = arith.constant 64 : index
    %331 = memref.load %arg2[%c64] : memref<81xf32, #tpu.memory_space<smem>>
    %332 = vector.extract_strided_slice %1 {offsets = [1, 1], sizes = [1, 256], strides = [1, 1]} : vector<3x384xf32> to vector<1x256xf32>
    %333 = vector.broadcast %331 : f32 to vector<1x256xf32>
    %334 = arith.mulf %333, %332 : vector<1x256xf32>
    %335 = arith.addf %330, %334 : vector<1x256xf32>
    %c65 = arith.constant 65 : index
    %336 = memref.load %arg2[%c65] : memref<81xf32, #tpu.memory_space<smem>>
    %337 = vector.extract_strided_slice %1 {offsets = [1, 2], sizes = [1, 256], strides = [1, 1]} : vector<3x384xf32> to vector<1x256xf32>
    %338 = vector.broadcast %336 : f32 to vector<1x256xf32>
    %339 = arith.mulf %338, %337 : vector<1x256xf32>
    %340 = arith.addf %335, %339 : vector<1x256xf32>
    %c66 = arith.constant 66 : index
    %341 = memref.load %arg2[%c66] : memref<81xf32, #tpu.memory_space<smem>>
    %342 = vector.extract_strided_slice %1 {offsets = [1, 16], sizes = [1, 256], strides = [1, 1]} : vector<3x384xf32> to vector<1x256xf32>
    %343 = vector.broadcast %341 : f32 to vector<1x256xf32>
    %344 = arith.mulf %343, %342 : vector<1x256xf32>
    %345 = arith.addf %340, %344 : vector<1x256xf32>
    %c67 = arith.constant 67 : index
    %346 = memref.load %arg2[%c67] : memref<81xf32, #tpu.memory_space<smem>>
    %347 = vector.extract_strided_slice %1 {offsets = [1, 17], sizes = [1, 256], strides = [1, 1]} : vector<3x384xf32> to vector<1x256xf32>
    %348 = vector.broadcast %346 : f32 to vector<1x256xf32>
    %349 = arith.mulf %348, %347 : vector<1x256xf32>
    %350 = arith.addf %345, %349 : vector<1x256xf32>
    %c68 = arith.constant 68 : index
    %351 = memref.load %arg2[%c68] : memref<81xf32, #tpu.memory_space<smem>>
    %352 = vector.extract_strided_slice %1 {offsets = [1, 18], sizes = [1, 256], strides = [1, 1]} : vector<3x384xf32> to vector<1x256xf32>
    %353 = vector.broadcast %351 : f32 to vector<1x256xf32>
    %354 = arith.mulf %353, %352 : vector<1x256xf32>
    %355 = arith.addf %350, %354 : vector<1x256xf32>
    %c69 = arith.constant 69 : index
    %356 = memref.load %arg2[%c69] : memref<81xf32, #tpu.memory_space<smem>>
    %357 = vector.extract_strided_slice %1 {offsets = [1, 32], sizes = [1, 256], strides = [1, 1]} : vector<3x384xf32> to vector<1x256xf32>
    %358 = vector.broadcast %356 : f32 to vector<1x256xf32>
    %359 = arith.mulf %358, %357 : vector<1x256xf32>
    %360 = arith.addf %355, %359 : vector<1x256xf32>
    %c70 = arith.constant 70 : index
    %361 = memref.load %arg2[%c70] : memref<81xf32, #tpu.memory_space<smem>>
    %362 = vector.extract_strided_slice %1 {offsets = [1, 33], sizes = [1, 256], strides = [1, 1]} : vector<3x384xf32> to vector<1x256xf32>
    %363 = vector.broadcast %361 : f32 to vector<1x256xf32>
    %364 = arith.mulf %363, %362 : vector<1x256xf32>
    %365 = arith.addf %360, %364 : vector<1x256xf32>
    %c71 = arith.constant 71 : index
    %366 = memref.load %arg2[%c71] : memref<81xf32, #tpu.memory_space<smem>>
    %367 = vector.extract_strided_slice %1 {offsets = [1, 34], sizes = [1, 256], strides = [1, 1]} : vector<3x384xf32> to vector<1x256xf32>
    %368 = vector.broadcast %366 : f32 to vector<1x256xf32>
    %369 = arith.mulf %368, %367 : vector<1x256xf32>
    %370 = arith.addf %365, %369 : vector<1x256xf32>
    %c72 = arith.constant 72 : index
    %371 = memref.load %arg2[%c72] : memref<81xf32, #tpu.memory_space<smem>>
    %372 = vector.extract_strided_slice %1 {offsets = [2, 0], sizes = [1, 256], strides = [1, 1]} : vector<3x384xf32> to vector<1x256xf32>
    %373 = vector.broadcast %371 : f32 to vector<1x256xf32>
    %374 = arith.mulf %373, %372 : vector<1x256xf32>
    %375 = arith.addf %370, %374 : vector<1x256xf32>
    %c73 = arith.constant 73 : index
    %376 = memref.load %arg2[%c73] : memref<81xf32, #tpu.memory_space<smem>>
    %377 = vector.extract_strided_slice %1 {offsets = [2, 1], sizes = [1, 256], strides = [1, 1]} : vector<3x384xf32> to vector<1x256xf32>
    %378 = vector.broadcast %376 : f32 to vector<1x256xf32>
    %379 = arith.mulf %378, %377 : vector<1x256xf32>
    %380 = arith.addf %375, %379 : vector<1x256xf32>
    %c74 = arith.constant 74 : index
    %381 = memref.load %arg2[%c74] : memref<81xf32, #tpu.memory_space<smem>>
    %382 = vector.extract_strided_slice %1 {offsets = [2, 2], sizes = [1, 256], strides = [1, 1]} : vector<3x384xf32> to vector<1x256xf32>
    %383 = vector.broadcast %381 : f32 to vector<1x256xf32>
    %384 = arith.mulf %383, %382 : vector<1x256xf32>
    %385 = arith.addf %380, %384 : vector<1x256xf32>
    %c75 = arith.constant 75 : index
    %386 = memref.load %arg2[%c75] : memref<81xf32, #tpu.memory_space<smem>>
    %387 = vector.extract_strided_slice %1 {offsets = [2, 16], sizes = [1, 256], strides = [1, 1]} : vector<3x384xf32> to vector<1x256xf32>
    %388 = vector.broadcast %386 : f32 to vector<1x256xf32>
    %389 = arith.mulf %388, %387 : vector<1x256xf32>
    %390 = arith.addf %385, %389 : vector<1x256xf32>
    %c76 = arith.constant 76 : index
    %391 = memref.load %arg2[%c76] : memref<81xf32, #tpu.memory_space<smem>>
    %392 = vector.extract_strided_slice %1 {offsets = [2, 17], sizes = [1, 256], strides = [1, 1]} : vector<3x384xf32> to vector<1x256xf32>
    %393 = vector.broadcast %391 : f32 to vector<1x256xf32>
    %394 = arith.mulf %393, %392 : vector<1x256xf32>
    %395 = arith.addf %390, %394 : vector<1x256xf32>
    %c77 = arith.constant 77 : index
    %396 = memref.load %arg2[%c77] : memref<81xf32, #tpu.memory_space<smem>>
    %397 = vector.extract_strided_slice %1 {offsets = [2, 18], sizes = [1, 256], strides = [1, 1]} : vector<3x384xf32> to vector<1x256xf32>
    %398 = vector.broadcast %396 : f32 to vector<1x256xf32>
    %399 = arith.mulf %398, %397 : vector<1x256xf32>
    %400 = arith.addf %395, %399 : vector<1x256xf32>
    %c78 = arith.constant 78 : index
    %401 = memref.load %arg2[%c78] : memref<81xf32, #tpu.memory_space<smem>>
    %402 = vector.extract_strided_slice %1 {offsets = [2, 32], sizes = [1, 256], strides = [1, 1]} : vector<3x384xf32> to vector<1x256xf32>
    %403 = vector.broadcast %401 : f32 to vector<1x256xf32>
    %404 = arith.mulf %403, %402 : vector<1x256xf32>
    %405 = arith.addf %400, %404 : vector<1x256xf32>
    %c79 = arith.constant 79 : index
    %406 = memref.load %arg2[%c79] : memref<81xf32, #tpu.memory_space<smem>>
    %407 = vector.extract_strided_slice %1 {offsets = [2, 33], sizes = [1, 256], strides = [1, 1]} : vector<3x384xf32> to vector<1x256xf32>
    %408 = vector.broadcast %406 : f32 to vector<1x256xf32>
    %409 = arith.mulf %408, %407 : vector<1x256xf32>
    %410 = arith.addf %405, %409 : vector<1x256xf32>
    %c80 = arith.constant 80 : index
    %411 = memref.load %arg2[%c80] : memref<81xf32, #tpu.memory_space<smem>>
    %412 = vector.extract_strided_slice %1 {offsets = [2, 34], sizes = [1, 256], strides = [1, 1]} : vector<3x384xf32> to vector<1x256xf32>
    %413 = vector.broadcast %411 : f32 to vector<1x256xf32>
    %414 = arith.mulf %413, %412 : vector<1x256xf32>
    %415 = arith.addf %410, %414 : vector<1x256xf32>
    %c2_7 = arith.constant 2 : index
    %416 = memref.load %arg3[%c2_7] : memref<3xf32, #tpu.memory_space<smem>>
    %417 = vector.broadcast %416 : f32 to vector<1x256xf32>
    %418 = arith.addf %415, %417 : vector<1x256xf32>
    %419 = tpu.concatenate %140, %279, %418 in 0 : vector<1x256xf32>, vector<1x256xf32>, vector<1x256xf32> -> vector<3x256xf32>
    %c0_8 = arith.constant 0 : index
    %c0_9 = arith.constant 0 : index
    %c0_10 = arith.constant 0 : index
    %420 = vector.load %arg4[%c0_8, %c0_9, %c0_10] : memref<1x3x256xf32, #tpu.memory_space<vmem>>, vector<1x3x256xf32>
    %421 = vector.shape_cast %420 : vector<1x3x256xf32> to vector<3x256xf32>
    %422 = vector.shape_cast %419 : vector<3x256xf32> to vector<1x3x256xf32>
    tpu.vector_store %arg4[%c0_8, %c0_9, %c0_10], %422 {strides = array<i32>} : memref<1x3x256xf32, #tpu.memory_space<vmem>>, vector<1x3x256xf32>,
    return
  }
  func.func @transform_0(%arg0: i32) -> (i32, i32, i32) {
    %c0_i32 = arith.constant 0 : i32
    %c0_i32_0 = arith.constant 0 : i32
    %c0_i32_1 = arith.constant 0 : i32
    return %arg0, %c0_i32, %c0_i32_0 : i32, i32, i32
  }
  func.func @transform_1(%arg0: i32) -> i32 {
    %c0_i32 = arith.constant 0 : i32
    %c0_i32_0 = arith.constant 0 : i32
    return %c0_i32 : i32
  }
  func.func @transform_2(%arg0: i32) -> i32 {
    %c0_i32 = arith.constant 0 : i32
    %c0_i32_0 = arith.constant 0 : i32
    return %c0_i32 : i32
  }
  func.func @transform_3(%arg0: i32) -> (i32, i32, i32) {
    %c0_i32 = arith.constant 0 : i32
    %c0_i32_0 = arith.constant 0 : i32
    %c0_i32_1 = arith.constant 0 : i32
    return %arg0, %c0_i32, %c0_i32_0 : i32, i32, i32
  }
}

</mosaic_0001>

<bundles_post_ra>
// kernel: tpu_custom_call.1
= control target key start
LH: loop header
LB: loop body
LE: loop exit
PB: predicated region body
PF: predicated region fallthrough
CT: control target
= control target key end

     0   :  { %8 = vsyncpa [#allocation3], 0  ;;  %s2978_s0 = inlined_call_operand.vmem [shape: f32[2,3,384], index: 0, kind: input, shape index: {}]   ;;  %s2979_s1 = inlined_call_operand.vmem [shape: f32[81], index: 1, kind: input, shape index: {}]   ;;  %s2980_s2 = inlined_call_operand.vmem [shape: f32[3], index: 2, kind: input, shape index: {}]   ;;  %s2981_s3 = inlined_call_operand.vmem [shape: f32[2,3,256], index: 3, kind: output, shape index: {}]  }
   0x1   :  { %9 = vsyncpa [#allocation5], 0  ;;  %s2058_s12 = smov 0  }
   0x2 LB: > { %s2064_s13 = sadd.s32 4294967295, %s2026_s12   ;;  %p1745_p0 = scmp.ge.s32.totalorder %s2026_s12, 1  ;;  %s2026_s12 = sphi %s2058_s12, %s15_s12  }
   0x3   : > { %p114_p1 = scmp.lt.s32.totalorder %s2026_s12, 3  ;;  %s127_s16 = sshll.u32 %s2979_s1, 4  ;;  %s128_s16 = int_to_ptr.vmem [resolvable:$true] %s127_s16 }
   0x4   : > { %p2982_p3 = scmp.eq.s32.totalorder %s2064_s13, 0  ;;  %s138_s20 = sshll.u32 %s2980_s2, 4  ;;  %s139_s20 = int_to_ptr.vmem [resolvable:$true] %s138_s20 }
   0x5   : > { %p2071_p2 = pnand %p1745_p0, %p114_p1  ;;  %s1982_s22 = scalar_lea.vmem %s128_s16, 16 }
   0x6   : > { %p1983_p6 = scmp.ne.s32.totalorder %s128_s16, %s1982_s22  ;;  %p1990_p10 = scmp.lt.s32.totalorder %s128_s16, %s128_s16 }
   0x7   : > { %s2988_s17 = scalar_select %p2071_p2, 1, 0 }
   0x8   : > { %p1951_p4 = pneg %p2071_p2  ;;  %p1991_p11 = scmp.lt.s32.totalorder %s1982_s22, %s1982_s22 }
   0xa   : > { %p2083_p5 = pnand %p2982_p3, %p1951_p4  ;;  %p1992_p12 = por %p1991_p11, %p1990_p10 }
   0xc   : > { %p1984_p7 = pneg %p2083_p5 }
   0xe   : > { %p1985_p8 = pnand %p1984_p7, %p1983_p6 }
  0x10   : > { %p1986_p9 = pneg %p1985_p8 }
  0x12   : > { %p1993_p13 = pnand %p1992_p12, %p1986_p9 }
  0x14   : > { %1996 = shalt.err (!%p1993_p13)
}
  0x15   : > { %s2028_s23 = smov [#allocation2]   ;;  %s1997_s24 = scalar_lea.vmem %s139_s20, 16 }
  0x16   : > { %1954 = dma.vmem_to_smem (!%p2083_p5), %s128_s16, 16, %s2028_s23, [#allocation3]  }
  0x17   : > { %p1998_p0 = scmp.ne.s32.totalorder %s139_s20, %s1997_s24  ;;  %p2005_p3 = scmp.lt.s32.totalorder %s139_s20, %s139_s20 }
  0x18   : > { %p2006_p2 = scmp.lt.s32.totalorder %s1997_s24, %s1997_s24 }
  0x19   : > { %p2000_p1 = pnand %p1998_p0, %p1984_p7 }
  0x1a   : > { %p2007_p6 = por %p2006_p2, %p2005_p3 }
  0x1b   : > { %p2001_p4 = pneg %p2000_p1 }
  0x1d   : > { %p2008_p8 = pnand %p2007_p6, %p2001_p4 }
  0x1f   : > { %2011 = shalt.err (!%p2008_p8)
}
  0x20   : > { %s2029_s25 = smov [#allocation4]   ;;  %p2990_p9 = scmp.ne.s32.totalorder %s2988_s17, 0 }
  0x21   : > { %1957 = dma.vmem_to_smem (!%p2083_p5), %s139_s20, 16, %s2029_s25, [#allocation5]  }
  0x22   : > { %159 = sbr.rel (%p2990_p9) target bundleno = 471 (0x1d7), region = 32 }
  0x27   : > { %p2991_p10 = scmp.eq.s32.totalorder %s2064_s13, 0 }
  0x29   : > { %2017 = dma.done.wait (%p2991_p10), [#allocation3], 16   ;;  %p2992_p11 = pmov %p2991_p10 }
  0x2a   : > { %p2993_p7 = pmov %p2991_p10 }
  0x2b   : > { %2019 = vsyncadd (%p2992_p11), [#allocation3], 4294967280 }
  0x2c   : > { %2021 = dma.done.wait (%p2993_p7), [#allocation5], 16   ;;  %p2994_p2 = pmov %p2993_p7 }
  0x2e   : > { %2023 = vsyncadd (%p2994_p2), [#allocation5], 4294967280 }
  0x2f   : > { %169 = sfence }
  0x30   : > { %p188_p3 = scmp.lt.s32.totalorder %s2064_s13, 1  ;;  %s1756_s26 = sld [smem:[#allocation2 + $0x2]]  ;;  %vm216_vm0 = vcmask 1043456   ;;  %vm337_vm1 = vcmask 769024   ;;  %vm218_vm2 = vcmask 1039360   ;;  %vm235_vm3 = vcmask 1031168  }
  0x31   : > { %s1755_s27 = sld [smem:[#allocation2 + $0x1]]  ;;  %s2030_s7 = smov 126   ;;  %vm252_vm4 = vcmask 916480   ;;  %vm269_vm5 = vcmask 908288   ;;  %vm286_vm6 = vcmask 900096   ;;  %vm303_vm7 = vcmask 785408  }
  0x32   : > { %s3016_s13 = smov (!%p188_p3, %s2064_s13), 1  ;;  %s1757_s28 = sld [smem:[#allocation2 + $0x3]]  ;;  %vm320_vm8 = vcmask 777216   ;;  %vm1655_vm9 = vcmask 1040384   ;;  %vm1658_vm10 = vcmask 1041408  }
  0x33   : > { %s1942_s29 = smul.u32 12, %s3016_s13  ;;  %s1758_s6 = sld [smem:[#allocation2 + $0x4]] }
  0x34   : > { %s2031_s8 = smov 127   ;;  %s1759_s9 = sld [smem:[#allocation2 + $0x5]] }
  0x35   : > { %s2111_s5 = scalar_lea.vmem %s2978_s0, %s1942_s29  ;;  %s1760_s10 = sld [smem:[#allocation2 + $0x6]] }
  0x36   : > { %v223_v0 = vstv %s1756_s26  ;;  %v2114_v1 = vld [vmem:[%s2111_s5] sm:$0x77]  ;;  %v2117_v2 = vld [vmem:[%s2111_s5 + $0x8] sm:$0x7]  ;;  %s2032_s11 = smov 112   ;;  %s1761_s14 = sld [smem:[#allocation2 + $0x7]] }
  0x37   : > { %v205_v3 = vstv %s1755_s27  ;;  %v224_v4 = vmul.f32 %v223_v0, %v2114_v1  ;;  %v225_v6 = vmul.f32 %v223_v0, %v2117_v2  ;;  %s2033_s15 = smov 111   ;;  %s1762_s16 = sld [smem:[#allocation2 + $0x8]] }
  0x38   : > { %v206_v5 = vmul.f32 %v205_v3, %v2114_v1  ;;  %v207_v7 = vmul.f32 %v205_v3, %v2117_v2  ;;  %v240_v8 = vstv %s1757_s28  ;;  %s1765_s17 = sld [smem:[#allocation2 + $0xa]]  ;;  %s2034_s18 = smov 110  }
  0x39   : > { %228 = vrot.lane.b32.xlu1 %v224_v4, %s2030_s7  ;;  %v242_v9 = vmul.f32 %v240_v8, %v2117_v2  ;;  %v241_v10 = vmul.f32 %v240_v8, %v2114_v1  ;;  %v257_v11 = vstv %s1758_s6  ;;  %s1768_s19 = sld [smem:[#allocation2 + $0xb]]  ;;  %s2035_s20 = smov 96  }
  0x3a   : > { %210 = vrot.lane.b32.xlu0 %v206_v5, %s2031_s8  ;;  %v259_v12 = vmul.f32 %v257_v11, %v2117_v2  ;;  %v258_v13 = vmul.f32 %v257_v11, %v2114_v1  ;;  %v274_v14 = vstv %s1759_s9  ;;  %s1771_s21 = sld [smem:[#allocation2 + $0xc]]  ;;  %s2036_s22 = smov 95  }
  0x3b   : > { %v276_v15 = vmul.f32 %v274_v14, %v2117_v2  ;;  %v275_v16 = vmul.f32 %v274_v14, %v2114_v1  ;;  %v291_v17 = vstv %s1760_s10  ;;  %s1774_s23 = sld [smem:[#allocation2 + $0xd]]  ;;  %s2037_s24 = smov 94  }
  0x3c   : > { %v293_v18 = vmul.f32 %v291_v17, %v2117_v2  ;;  %v292_v19 = vmul.f32 %v291_v17, %v2114_v1  ;;  %v308_v20 = vstv %s1761_s14  ;;  %s1777_s25 = sld [smem:[#allocation2 + $0xe]] }
  0x3d   : > { %230 = vrot.lane.b32.xlu1 %v225_v6, %s2030_s7  ;;  %v310_v21 = vmul.f32 %v308_v20, %v2117_v2  ;;  %v309_v22 = vmul.f32 %v308_v20, %v2114_v1  ;;  %v325_v23 = vstv %s1762_s16  ;;  %s1780_s26 = sld [smem:[#allocation2 + $0xf]] }
  0x3e   : > { %212 = vrot.lane.b32.xlu0 %v207_v7, %s2031_s8  ;;  %v350_v24 = vstv %s1765_s17  ;;  %v327_v25 = vmul.f32 %v325_v23, %v2117_v2  ;;  %v326_v26 = vmul.f32 %v325_v23, %v2114_v1  ;;  %s1783_s27 = sld [smem:[#allocation2 + $0x10]] }
  0x3f   : > { %v352_v27 = vmul.f32 %v350_v24, %v2117_v2  ;;  %v351_v28 = vmul.f32 %v350_v24, %v2114_v1  ;;  %v370_v29 = vstv %s1768_s19  ;;  %s1786_s28 = sld [smem:[#allocation2 + $0x11]] }
  0x40   : > { %v372_v32 = vmul.f32 %v370_v29, %v2117_v2  ;;  %v371_v33 = vmul.f32 %v370_v29, %v2114_v1  ;;  %v390_v34 = vstv %s1771_s21  ;;  %s1791_s29 = sld [smem:[#allocation2 + $0x13]] }
  0x41   : > { %247 = vrot.lane.b32.xlu1 %v242_v9, %s2032_s11  ;;  %v1767_v30 = vrot.slane %v352_v27, 9  ;;  %v1766_v31 = vrot.slane %v351_v28, 9  ;;  %v392_v37 = vmul.f32 %v390_v34, %v2117_v2  ;;  %v391_v38 = vmul.f32 %v390_v34, %v2114_v1  ;;  %s1794_s30 = sld [smem:[#allocation2 + $0x14]] }
  0x42   : > { %245 = vrot.lane.b32.xlu0 %v241_v10, %s2032_s11  ;;  %v1770_v35 = vrot.slane %v372_v32, 9  ;;  %v1769_v36 = vrot.slane %v371_v33, 9  ;;  %v410_v39 = vstv %s1774_s23  ;;  %v430_v44 = vstv %s1777_s25  ;;  %s1797_s4 = sld [smem:[#allocation2 + $0x15]] }
  0x43   : > { %v1773_v40 = vrot.slane %v392_v37, 9  ;;  %v1772_v41 = vrot.slane %v391_v38, 9  ;;  %v412_v42 = vmul.f32 %v410_v39, %v2117_v2  ;;  %v411_v43 = vmul.f32 %v410_v39, %v2114_v1  ;;  %s1800_s6 = sld [smem:[#allocation2 + $0x16]] }
  0x44   : > { %v432_v47 = vmul.f32 %v430_v44, %v2117_v2  ;;  %v431_v48 = vmul.f32 %v430_v44, %v2114_v1  ;;  %v450_v49 = vstv %s1780_s26  ;;  %v470_v54 = vstv %s1783_s27  ;;  %s1803_s9 = sld [smem:[#allocation2 + $0x17]] }
  0x45   : > { %264 = vrot.lane.b32.xlu1 %v259_v12, %s2033_s15  ;;  %v1776_v45 = vrot.slane %v412_v42, 9  ;;  %v1775_v46 = vrot.slane %v411_v43, 9  ;;  %v452_v52 = vmul.f32 %v450_v49, %v2117_v2  ;;  %v451_v53 = vmul.f32 %v450_v49, %v2114_v1  ;;  %s1806_s10 = sld [smem:[#allocation2 + $0x18]] }
  0x46   : > { %262 = vrot.lane.b32.xlu0 %v258_v13, %s2033_s15  ;;  %v1779_v50 = vrot.slane %v432_v47, 9  ;;  %v1778_v51 = vrot.slane %v431_v48, 9  ;;  %v472_v57 = vmul.f32 %v470_v54, %v2117_v2  ;;  %v471_v58 = vmul.f32 %v470_v54, %v2114_v1  ;;  %s1809_s14 = sld [smem:[#allocation2 + $0x19]] }
  0x47   : > { %v1782_v55 = vrot.slane %v452_v52, 9  ;;  %v1781_v56 = vrot.slane %v451_v53, 9  ;;  %v490_v59 = vstv %s1786_s28  ;;  %v518_v0 = vstv %s1791_s29  ;;  %s1812_s16 = sld [smem:[#allocation2 + $0x1a]] }
  0x48   : > { %v1785_v60 = vrot.slane %v472_v57, 9  ;;  %v1784_v61 = vrot.slane %v471_v58, 9  ;;  %v492_v62 = vmul.f32 %v490_v59, %v2117_v2  ;;  %v491_v63 = vmul.f32 %v490_v59, %v2114_v1  ;;  %s1816_s17 = sld [smem:[#allocation2 + $0x1c]] }
  0x49   : > { %281 = vrot.lane.b32.xlu1 %v276_v15, %s2034_s18  ;;  %v520_v5 = vmul.f32 %v518_v0, %v2117_v2  ;;  %v519_v6 = vmul.f32 %v518_v0, %v2114_v1  ;;  %v538_v7 = vstv %s1794_s30  ;;  %v558_v12 = vstv %s1797_s4  ;;  %s1817_s19 = sld [smem:[#allocation2 + $0x1d]] }
  0x4a   : > { %279 = vrot.lane.b32.xlu0 %v275_v16, %s2034_s18  ;;  %v1788_v3 = vrot.slane %v492_v62, 9  ;;  %v1787_v4 = vrot.slane %v491_v63, 9  ;;  %v540_v10 = vmul.f32 %v538_v7, %v2117_v2  ;;  %v539_v11 = vmul.f32 %v538_v7, %v2114_v1  ;;  %s1818_s21 = sld [smem:[#allocation2 + $0x1e]] }
  0x4b   : > { %v1793_v8 = vrot.slane %v520_v5, 10  ;;  %v1792_v9 = vrot.slane %v519_v6, 10  ;;  %v560_v15 = vmul.f32 %v558_v12, %v2117_v2  ;;  %v559_v16 = vmul.f32 %v558_v12, %v2114_v1  ;;  %s1819_s23 = sld [smem:[#allocation2 + $0x1f]] }
  0x4c   : > { %v1796_v13 = vrot.slane %v540_v10, 10  ;;  %v1795_v14 = vrot.slane %v539_v11, 10  ;;  %v578_v17 = vstv %s1800_s6  ;;  %v618_v27 = vstv %s1806_s10  ;;  %s1820_s25 = sld [smem:[#allocation2 + $0x20]] }
  0x4d   : > { %298 = vrot.lane.b32.xlu1 %v293_v18, %s2035_s20  ;;  %v1799_v18 = vrot.slane %v560_v15, 10  ;;  %v580_v20 = vmul.f32 %v578_v17, %v2117_v2  ;;  %v638_v32 = vstv %s1809_s14  ;;  %v658_v37 = vstv %s1812_s16  ;;  %s1821_s26 = sld [smem:[#allocation2 + $0x21]] }
  0x4e   : > { %296 = vrot.lane.b32.xlu0 %v292_v19, %s2035_s20  ;;  %v1798_v19 = vrot.slane %v559_v16, 10  ;;  %v685_v44 = vstv %s1816_s17  ;;  %s1822_s27 = sld [smem:[#allocation2 + $0x22]] }
  0x4f   : > { %v1802_v23 = vrot.slane %v580_v20, 10  ;;  %v701_v47 = vstv %s1817_s19  ;;  %s1823_s28 = sld [smem:[#allocation2 + $0x23]] }
  0x50   : > { %v703_v48 = vmul.f32 %v701_v47, %v2117_v2  ;;  %v702_v49 = vmul.f32 %v701_v47, %v2114_v1  ;;  %s1826_s29 = sld [smem:[#allocation2 + $0x25]] }
  0x51   : > { %315 = vrot.lane.b32.xlu1 %v310_v21, %s2036_s22  ;;  %v579_v21 = vmul.f32 %v578_v17, %v2114_v1  ;;  %v733_v53 = vstv %s1819_s23  ;;  %s1829_s30 = sld [smem:[#allocation2 + $0x26]] }
  0x52   : > { %313 = vrot.lane.b32.xlu0 %v309_v22, %s2036_s22  ;;  %v598_v22 = vstv %s1803_s9  ;;  %v735_v54 = vmul.f32 %v733_v53, %v2117_v2  ;;  %s1832_s4 = sld [smem:[#allocation2 + $0x27]] }
  0x53   : > { %v1801_v24 = vrot.slane %v579_v21, 10  ;;  %v765_v59 = vstv %s1821_s26  ;;  %s1835_s6 = sld [smem:[#allocation2 + $0x28]] }
  0x54   : > { %v781_v62 = vstv %s1822_s27  ;;  %s1838_s9 = sld [smem:[#allocation2 + $0x29]] }
  0x55   : > { %332 = vrot.lane.b32.xlu1 %v327_v25, %s2037_s24  ;;  %v600_v25 = vmul.f32 %v598_v22, %v2117_v2  ;;  %v797_v5 = vstv %s1823_s28  ;;  %s1841_s10 = sld [smem:[#allocation2 + $0x2a]] }
  0x56   : > { %330 = vrot.lane.b32.xlu0 %v326_v26, %s2037_s24  ;;  %v599_v26 = vmul.f32 %v598_v22, %v2114_v1  ;;  %v821_v6 = vstv %s1826_s29  ;;  %v798_v10 = vmul.f32 %v797_v5, %v2114_v1  ;;  %s1844_s14 = sld [smem:[#allocation2 + $0x2b]] }
  0x57   : > { %v1805_v28 = vrot.slane %v600_v25, 10  ;;  %v823_v11 = vmul.f32 %v821_v6, %v2117_v2  ;;  %v822_v12 = vmul.f32 %v821_v6, %v2114_v1  ;;  %s1847_s16 = sld [smem:[#allocation2 + $0x2c]] }
  0x58   : > { %v1804_v29 = vrot.slane %v599_v26, 10  ;;  %v861_v20 = vstv %s1832_s4  ;;  %s1852_s17 = sld [smem:[#allocation2 + $0x2e]] }
  0x59   : > { %361 = vrot.lane.b32.xlu1 %v1767_v30, %s2031_s8  ;;  %v620_v30 = vmul.f32 %v618_v27, %v2117_v2  ;;  %v1828_v16 = vrot.slane %v823_v11, 9  ;;  %v1827_v17 = vrot.slane %v822_v12, 9  ;;  %v863_v25 = vmul.f32 %v861_v20, %v2117_v2  ;;  %s1855_s19 = sld [smem:[#allocation2 + $0x2f]] }
  0x5a   : > { %359 = vrot.lane.b32.xlu0 %v1766_v31, %s2031_s8  ;;  %v619_v31 = vmul.f32 %v618_v27, %v2114_v1  ;;  %v862_v26 = vmul.f32 %v861_v20, %v2114_v1  ;;  %v881_v27 = vstv %s1835_s6  ;;  %s1879_s23 = sld [smem:[#allocation2 + $0x38]] }
  0x5b   : > { %v1808_v33 = vrot.slane %v620_v30, 10  ;;  %v1834_v30 = vrot.slane %v863_v25, 9  ;;  %s1881_s26 = sld [smem:[#allocation2 + $0x3a]] }
  0x5c   : > { %v1807_v34 = vrot.slane %v619_v31, 10  ;;  %v1833_v31 = vrot.slane %v862_v26, 9  ;;  %s1882_s27 = sld [smem:[#allocation2 + $0x3b]] }
  0x5d   : > { %381 = vrot.lane.b32.xlu1 %v1770_v35, %s2030_s7  ;;  %v640_v35 = vmul.f32 %v638_v32, %v2117_v2  ;;  %s1883_s28 = sld [smem:[#allocation2 + $0x3c]] }
  0x5e   : > { %379 = vrot.lane.b32.xlu0 %v1769_v36, %s2030_s7  ;;  %v639_v36 = vmul.f32 %v638_v32, %v2114_v1  ;;  %v883_v32 = vmul.f32 %v881_v27, %v2117_v2  ;;  %s1884_s29 = sld [smem:[#allocation2 + $0x3d]] }
  0x5f   : > { %v1811_v38 = vrot.slane %v640_v35, 10  ;;  %v1009_v11 = vstv %s1855_s19  ;;  %s1885_s4 = sld [smem:[#allocation2 + $0x3e]] }
  0x60   : > { %v1810_v39 = vrot.slane %v639_v36, 10  ;;  %s1891_s6 = sld [smem:[#allocation2 + $0x41]] }
  0x61   : > { %401 = vrot.lane.b32.xlu1 %v1773_v40, %s2032_s11  ;;  %v660_v40 = vmul.f32 %v658_v37, %v2117_v2  ;;  %s2430_s19 = sld [smem:[#allocation2 + $0x46]] }
  0x62   : > { %399 = vrot.lane.b32.xlu0 %v1772_v41, %s2032_s11  ;;  %v659_v41 = vmul.f32 %v658_v37, %v2114_v1  ;;  %v1837_v37 = vrot.slane %v883_v32, 9 }
  0x63   : > { %v1814_v42 = vrot.slane %v660_v40, 10 }
  0x64   : > { %v1813_v43 = vrot.slane %v659_v41, 10  ;;  %v921_v41 = vstv %s1841_s10  ;;  %s1897_s10 = sld [smem:[#allocation2 + $0x43]] }
  0x65   : > { %421 = vrot.lane.b32.xlu1 %v1776_v45, %s2033_s15  ;;  %v687_v45 = vmul.f32 %v685_v44, %v2117_v2  ;;  %v922_v47 = vmul.f32 %v921_v41, %v2114_v1 }
  0x66   : > { %419 = vrot.lane.b32.xlu0 %v1775_v46, %s2033_s15  ;;  %v686_v46 = vmul.f32 %v685_v44, %v2114_v1 }
  0x69   : > { %441 = vrot.lane.b32.xlu1 %v1779_v50, %s2034_s18  ;;  %v717_v50 = vstv %s1818_s21  ;;  %s1878_s21 = sld [smem:[#allocation2 + $0x37]] }
  0x6a   : > { %439 = vrot.lane.b32.xlu0 %v1778_v51, %s2034_s18  ;;  %v719_v51 = vmul.f32 %v717_v50, %v2117_v2  ;;  %v718_v52 = vmul.f32 %v717_v50, %v2114_v1 }
  0x6d   : > { %461 = vrot.lane.b32.xlu1 %v1782_v55, %s2035_s20  ;;  %v734_v55 = vmul.f32 %v733_v53, %v2114_v1 }
  0x6e   : > { %459 = vrot.lane.b32.xlu0 %v1781_v56, %s2035_s20  ;;  %v749_v56 = vstv %s1820_s25  ;;  %s1880_s25 = sld [smem:[#allocation2 + $0x39]] }
  0x6f   : > { %v751_v57 = vmul.f32 %v749_v56, %v2117_v2  ;;  %v750_v58 = vmul.f32 %v749_v56, %v2114_v1  ;;  %v1156_v26 = vstv %s1878_s21  ;;  %s2438_s21 = sld [smem:[#allocation2 + $0x47]] }
  0x70   : > { %v1157_v32 = vmul.f32 %v1156_v26, %v2114_v1 }
  0x71   : > { %481 = vrot.lane.b32.xlu1 %v1785_v60, %s2036_s22  ;;  %v767_v60 = vmul.f32 %v765_v59, %v2117_v2 }
  0x72   : > { %479 = vrot.lane.b32.xlu0 %v1784_v61, %s2036_s22  ;;  %v766_v61 = vmul.f32 %v765_v59, %v2114_v1 }
  0x75   : > { %501 = vrot.lane.b32.xlu1 %v1788_v3, %s2037_s24  ;;  %v783_v3 = vmul.f32 %v781_v62, %v2117_v2 }
  0x76   : > { %499 = vrot.lane.b32.xlu0 %v1787_v4, %s2037_s24  ;;  %v782_v4 = vmul.f32 %v781_v62, %v2114_v1  ;;  %v989_v62 = vstv %s1852_s17  ;;  %s2423_s17 = sld [smem:[#allocation2 + $0x1b]] }
  0x79   : > { %529 = vrot.lane.b32.xlu1 %v1793_v8, %s2031_s8 }
  0x7a   : > { %527 = vrot.lane.b32.xlu0 %v1792_v9, %s2031_s8  ;;  %v799_v9 = vmul.f32 %v797_v5, %v2117_v2 }
  0x7d   : > { %549 = vrot.lane.b32.xlu1 %v1796_v13, %s2030_s7  ;;  %v841_v13 = vstv %s1829_s30  ;;  %s1888_s30 = sld [smem:[#allocation2 + $0x40]] }
  0x7e   : > { %547 = vrot.lane.b32.xlu0 %v1795_v14, %s2030_s7 }
  0x81   : > { %569 = vrot.lane.b32.xlu1 %v1799_v18, %s2032_s11  ;;  %v843_v18 = vmul.f32 %v841_v13, %v2117_v2 }
  0x82   : > { %567 = vrot.lane.b32.xlu0 %v1798_v19, %s2032_s11  ;;  %v842_v19 = vmul.f32 %v841_v13, %v2114_v1 }
  0x85   : > { %589 = vrot.lane.b32.xlu1 %v1802_v23, %s2033_s15  ;;  %v1831_v23 = vrot.slane %v843_v18, 9  ;;  %v1011_v18 = vmul.f32 %v1009_v11, %v2117_v2 }
  0x86   : > { %587 = vrot.lane.b32.xlu0 %v1801_v24, %s2033_s15  ;;  %v1830_v24 = vrot.slane %v842_v19, 9  ;;  %v1010_v19 = vmul.f32 %v1009_v11, %v2114_v1 }
  0x88   : > { %v1856_v25 = vrot.slane %v1010_v19, 10  ;;  %v1292_v19 = vstv %s1888_s30  ;;  %s2533_s30 = sld [smem:[#allocation2 + $0x33]] }
  0x89   : > { %609 = vrot.lane.b32.xlu1 %v1805_v28, %s2034_s18 }
  0x8a   : > { %607 = vrot.lane.b32.xlu0 %v1804_v29, %s2034_s18 }
  0x8d   : > { %629 = vrot.lane.b32.xlu1 %v1808_v33, %s2035_s20  ;;  %v882_v33 = vmul.f32 %v881_v27, %v2114_v1 }
  0x8e   : > { %627 = vrot.lane.b32.xlu0 %v1807_v34, %s2035_s20  ;;  %v901_v34 = vstv %s1838_s9  ;;  %s1894_s9 = sld [smem:[#allocation2 + $0x42]] }
  0x8f   : > { %v902_v40 = vmul.f32 %v901_v34, %v2114_v1 }
  0x91   : > { %649 = vrot.lane.b32.xlu1 %v1811_v38, %s2036_s22  ;;  %v1836_v38 = vrot.slane %v882_v33, 9  ;;  %v1172_v33 = vstv %s1879_s23  ;;  %s2450_s23 = sld [smem:[#allocation2 + $0x49]] }
  0x92   : > { %647 = vrot.lane.b32.xlu0 %v1810_v39, %s2036_s22  ;;  %v903_v39 = vmul.f32 %v901_v34, %v2117_v2 }
  0x94   : > { %v1840_v44 = vrot.slane %v903_v39, 9  ;;  %v1173_v39 = vmul.f32 %v1172_v33, %v2114_v1 }
  0x95   : > { %669 = vrot.lane.b32.xlu1 %v1814_v42, %s2037_s24 }
  0x96   : > { %667 = vrot.lane.b32.xlu0 %v1813_v43, %s2037_s24 }
  0x99   : > { %692 = vrot.lane.b32.xlu1 %v687_v45, %s2031_s8  ;;  %v1839_v45 = vrot.slane %v902_v40, 9  ;;  %v1188_v40 = vstv %s1880_s25  ;;  %s2459_s25 = sld [smem:[#allocation2 + $0x4a]] }
  0x9a   : > { %690 = vrot.lane.b32.xlu0 %v686_v46, %s2031_s8  ;;  %v923_v46 = vmul.f32 %v921_v41, %v2117_v2 }
  0x9d   : > { %708 = vrot.lane.b32.xlu1 %v703_v48, %s2030_s7  ;;  %v941_v48 = vstv %s1844_s14  ;;  %s2407_s14 = sld [smem:[#allocation2 + $0x44]] }
  0x9e   : > { %706 = vrot.lane.b32.xlu0 %v702_v49, %s2030_s7  ;;  %v943_v53 = vmul.f32 %v941_v48, %v2117_v2 }
  0xa1   : > { %724 = vrot.lane.b32.xlu1 %v719_v51, %s2032_s11  ;;  %v1843_v51 = vrot.slane %v923_v46, 9  ;;  %v1189_v46 = vmul.f32 %v1188_v40, %v2114_v1 }
  0xa2   : > { %722 = vrot.lane.b32.xlu0 %v718_v52, %s2032_s11  ;;  %v1842_v52 = vrot.slane %v922_v47, 9  ;;  %v1204_v47 = vstv %s1881_s26  ;;  %s2469_s26 = sld [smem:[#allocation2 + $0x30]] }
  0xa5   : > { %740 = vrot.lane.b32.xlu1 %v735_v54, %s2033_s15  ;;  %v942_v54 = vmul.f32 %v941_v48, %v2114_v1 }
  0xa6   : > { %738 = vrot.lane.b32.xlu0 %v734_v55, %s2033_s15  ;;  %v961_v55 = vstv %s1847_s16  ;;  %s2417_s16 = sld [smem:[#allocation2 + $0x45]] }
  0xa7   : > { %v1845_v59 = vrot.slane %v942_v54, 9  ;;  %v1220_v54 = vstv %s1882_s27  ;;  %s2478_s27 = sld [smem:[#allocation2 + $0x4b]] }
  0xa9   : > { %756 = vrot.lane.b32.xlu1 %v751_v57, %s2034_s18 }
  0xaa   : > { %754 = vrot.lane.b32.xlu0 %v750_v58, %s2034_s18  ;;  %v1846_v58 = vrot.slane %v943_v53, 9  ;;  %v1205_v53 = vmul.f32 %v1204_v47, %v2114_v1 }
  0xab   : > { %v2237_v63 = vpop.permute.xlu1 %228 }
  0xac   : > { %v2239_v0 = vpop.permute.xlu0 %210 }
  0xad   : > { %772 = vrot.lane.b32.xlu1 %v767_v60, %s2035_s20  ;;  %v963_v60 = vmul.f32 %v961_v55, %v2117_v2 }
  0xae   : > { %770 = vrot.lane.b32.xlu0 %v766_v61, %s2035_s20  ;;  %v962_v61 = vmul.f32 %v961_v55, %v2114_v1 }
  0xaf   : > { %v2245_v7 = vpop.permute.xlu1 %230  ;;  %v1849_v5 = vrot.slane %v963_v60, 9  ;;  %v1221_v60 = vmul.f32 %v1220_v54, %v2114_v1 }
  0xb0   : > { %v2247_v8 = vpop.permute.xlu0 %212  ;;  %v1848_v6 = vrot.slane %v962_v61, 9  ;;  %v1236_v61 = vstv %s1883_s28  ;;  %s2481_s28 = sld [smem:[#allocation2 + $0x24]] }
  0xb1   : > { %788 = vrot.lane.b32.xlu1 %v783_v3, %s2036_s22 }
  0xb2   : > { %786 = vrot.lane.b32.xlu0 %v782_v4, %s2036_s22 }
  0xb3   : > { %v2255_v14 = vpop.permute.xlu1 %247 }
  0xb4   : > { %v2257_v15 = vpop.permute.xlu0 %245 }
  0xb5   : > { %804 = vrot.lane.b32.xlu1 %v799_v9, %s2037_s24  ;;  %v991_v9 = vmul.f32 %v989_v62, %v2117_v2 }
  0xb6   : > { %802 = vrot.lane.b32.xlu0 %v798_v10, %s2037_s24  ;;  %v990_v10 = vmul.f32 %v989_v62, %v2114_v1 }
  0xb7   : > { %v2263_v21 = vpop.permute.xlu1 %264 }
  0xb8   : > { %v2265_v22 = vpop.permute.xlu0 %262 }
  0xb9   : > { %832 = vrot.lane.b32.xlu1 %v1828_v16, %s2031_s8  ;;  %v1854_v16 = vrot.slane %v991_v9, 10  ;;  %v1237_v9 = vmul.f32 %v1236_v61, %v2114_v1 }
  0xba   : > { %830 = vrot.lane.b32.xlu0 %v1827_v17, %s2031_s8  ;;  %v1853_v17 = vrot.slane %v990_v10, 10  ;;  %v1252_v10 = vstv %s1884_s29  ;;  %s2495_s29 = sld [smem:[#allocation2 + $0x31]] }
  0xbb   : > { %v2271_v28 = vpop.permute.xlu1 %281 }
  0xbc   : > { %v2273_v29 = vpop.permute.xlu0 %279 }
  0xbd   : > { %852 = vrot.lane.b32.xlu1 %v1831_v23, %s2030_s7 }
  0xbe   : > { %850 = vrot.lane.b32.xlu0 %v1830_v24, %s2030_s7  ;;  %v1857_v24 = vrot.slane %v1011_v18, 10  ;;  %v1253_v18 = vmul.f32 %v1252_v10, %v2114_v1 }
  0xbf   : > { %v2279_v35 = vpop.permute.xlu1 %298 }
  0xc0   : > { %v2281_v36 = vpop.permute.xlu0 %296 }
  0xc1   : > { %872 = vrot.lane.b32.xlu1 %v1834_v30, %s2032_s11 }
  0xc2   : > { %870 = vrot.lane.b32.xlu0 %v1833_v31, %s2032_s11  ;;  %v1158_v31 = vmul.f32 %v1156_v26, %v2117_v2 }
  0xc3   : > { %v2287_v42 = vpop.permute.xlu1 %315 }
  0xc4   : > { %v2289_v43 = vpop.permute.xlu0 %313 }
  0xc5   : > { %892 = vrot.lane.b32.xlu1 %v1837_v37, %s2033_s15 }
  0xc6   : > { %890 = vrot.lane.b32.xlu0 %v1836_v38, %s2033_s15  ;;  %v1174_v38 = vmul.f32 %v1172_v33, %v2117_v2 }
  0xc7   : > { %v2295_v49 = vpop.permute.xlu1 %332 }
  0xc8   : > { %v2297_v50 = vpop.permute.xlu0 %330 }
  0xc9   : > { %912 = vrot.lane.b32.xlu1 %v1840_v44, %s2034_s18 }
  0xca   : > { %910 = vrot.lane.b32.xlu0 %v1839_v45, %s2034_s18  ;;  %v1190_v45 = vmul.f32 %v1188_v40, %v2117_v2 }
  0xcb   : > { %v2303_v56 = vpop.permute.xlu1 %361 }
  0xcc   : > { %v2305_v57 = vpop.permute.xlu0 %359 }
  0xcd   : > { %932 = vrot.lane.b32.xlu1 %v1843_v51, %s2035_s20 }
  0xce   : > { %930 = vrot.lane.b32.xlu0 %v1842_v52, %s2035_s20  ;;  %v1206_v52 = vmul.f32 %v1204_v47, %v2117_v2 }
  0xcf   : > { %v2311_v3 = vpop.permute.xlu1 %381 }
  0xd0   : > { %v2313_v4 = vpop.permute.xlu0 %379 }
  0xd1   : > { %952 = vrot.lane.b32.xlu1 %v1846_v58, %s2036_s22 }
  0xd2   : > { %950 = vrot.lane.b32.xlu0 %v1845_v59, %s2036_s22  ;;  %v1222_v59 = vmul.f32 %v1220_v54, %v2117_v2  ;;  %v1332_v54 = vstv %s1894_s9  ;;  %s2571_s9 = sld [smem:[#allocation2 + $0x35]] }
  0xd3   : > { %v2319_v12 = vpop.permute.xlu1 %401 }
  0xd4   : > { %v2321_v13 = vpop.permute.xlu0 %399 }
  0xd5   : > { %972 = vrot.lane.b32.xlu1 %v1849_v5, %s2037_s24 }
  0xd6   : > { %970 = vrot.lane.b32.xlu0 %v1848_v6, %s2037_s24  ;;  %v1238_v6 = vmul.f32 %v1236_v61, %v2117_v2  ;;  %v1334_v61 = vmul.f32 %v1332_v54, %v2117_v2 }
  0xd7   : > { %v2327_v20 = vpop.permute.xlu1 %421 }
  0xd8   : > { %v2329_v23 = vpop.permute.xlu0 %419 }
  0xd9   : > { %1000 = vrot.lane.b32.xlu1 %v1854_v16, %s2031_s8 }
  0xda   : > { %998 = vrot.lane.b32.xlu0 %v1853_v17, %s2031_s8  ;;  %v1254_v17 = vmul.f32 %v1252_v10, %v2117_v2  ;;  %v1333_v10 = vmul.f32 %v1332_v54, %v2114_v1 }
  0xdb   : > { %v2333_v27 = vpop.permute.xlu1 %441 }
  0xdc   : > { %v2335_v30 = vpop.permute.xlu0 %439 }
  0xdd   : > { %1020 = vrot.lane.b32.xlu1 %v1857_v24, %s2030_s7  ;;  %v1268_v24 = vstv %s1885_s4  ;;  %s2551_s4 = sld [smem:[#allocation2 + $0x34]] }
  0xde   : > { %1018 = vrot.lane.b32.xlu0 %v1856_v25, %s2030_s7  ;;  %v1269_v33 = vmul.f32 %v1268_v24, %v2114_v1 }
  0xdf   : > { %v2341_v34 = vpop.permute.xlu1 %461 }
  0xe0   : > { %v2343_v37 = vpop.permute.xlu0 %459 }
  0xe1   : > { %1163 = vrot.lane.b32.xlu1 %v1158_v31, %s2031_s8  ;;  %v1294_v31 = vmul.f32 %v1292_v19, %v2117_v2 }
  0xe2   : > { %1161 = vrot.lane.b32.xlu0 %v1157_v32, %s2031_s8  ;;  %v1270_v32 = vmul.f32 %v1268_v24, %v2117_v2  ;;  %v1896_v24 = vrot.slane %v1334_v61, 9 }
  0xe3   : > { %v2349_v41 = vpop.permute.xlu1 %481 }
  0xe4   : > { %v2351_v44 = vpop.permute.xlu0 %479 }
  0xe5   : > { %1179 = vrot.lane.b32.xlu1 %v1174_v38, %s2030_s7  ;;  %v1293_v38 = vmul.f32 %v1292_v19, %v2114_v1 }
  0xe6   : > { %1177 = vrot.lane.b32.xlu0 %v1173_v39, %s2030_s7  ;;  %v1312_v39 = vstv %s1891_s6  ;;  %s2563_s6 = sld [smem:[#allocation2 + $0x2d]] }
  0xe7   : > { %v2357_v48 = vpop.permute.xlu1 %501  ;;  %v1889_v47 = vrot.slane %v1293_v38, 9  ;;  %v1372_v38 = vstv %s2407_s14  ;;  %s2747_s14 = sld [smem:[#allocation2 + $0x3f]] }
  0xe8   : > { %v2359_v51 = vpop.permute.xlu0 %499 }
  0xe9   : > { %1195 = vrot.lane.b32.xlu1 %v1190_v45, %s2032_s11 }
  0xea   : > { %1193 = vrot.lane.b32.xlu0 %v1189_v46, %s2032_s11  ;;  %v1890_v46 = vrot.slane %v1294_v31, 9  ;;  %v1895_v31 = vrot.slane %v1333_v10, 9  ;;  %v1392_v10 = vstv %s2417_s16  ;;  %s2837_s16 = sld [smem:[#allocation2 + $0x48]] }
  0xeb   : > { %v2365_v55 = vpop.permute.xlu1 %529 }
  0xec   : > { %v2367_v58 = vpop.permute.xlu0 %527 }
  0xed   : > { %1211 = vrot.lane.b32.xlu1 %v1206_v52, %s2033_s15  ;;  %v1314_v52 = vmul.f32 %v1312_v39, %v2117_v2 }
  0xee   : > { %1209 = vrot.lane.b32.xlu0 %v1205_v53, %s2033_s15  ;;  %v1313_v53 = vmul.f32 %v1312_v39, %v2114_v1 }
  0xef   : > { %v2373_v62 = vpop.permute.xlu1 %549 }
  0xf0   : > { %v2375_v5 = vpop.permute.xlu0 %547 }
  0xf1   : > { %1227 = vrot.lane.b32.xlu1 %v1222_v59, %s2034_s18 }
  0xf2   : > { %1225 = vrot.lane.b32.xlu0 %v1221_v60, %s2034_s18 }
  0xf3   : > { %v2381_v11 = vpop.permute.xlu1 %569 }
  0xf4   : > { %v2383_v16 = vpop.permute.xlu0 %567 }
  0xf5   : > { %1243 = vrot.lane.b32.xlu1 %v1238_v6, %s2035_s20  ;;  %v1893_v6 = vrot.slane %v1314_v52, 9 }
  0xf6   : > { %1241 = vrot.lane.b32.xlu0 %v1237_v9, %s2035_s20  ;;  %v1892_v9 = vrot.slane %v1313_v53, 9  ;;  %v1374_v53 = vmul.f32 %v1372_v38, %v2117_v2 }
  0xf7   : > { %v2389_v25 = vpop.permute.xlu1 %589 }
  0xf8   : > { %2995 = vst [vmem:[#allocation8_spill] sm:$0xff] %v2389_v25  ;;  %v2391_v26 = vpop.permute.xlu0 %587 }
  0xf9   : > { %2996 = vst [vmem:[#allocation9_spill] sm:$0xff] %v2391_v26  ;;  %1259 = vrot.lane.b32.xlu1 %v1254_v17, %s2036_s22  ;;  %v1352_v17 = vstv %s1897_s10  ;;  %s2734_s10 = sld [smem:[#allocation2 + $0x12]] }
  0xfa   : > { %1257 = vrot.lane.b32.xlu0 %v1253_v18, %s2036_s22 }
  0xfb   : > { %v2399_v40 = vpop.permute.xlu1 %609 }
  0xfc   : > { %2997 = vst [vmem:[#allocation10_spill] sm:$0xff] %v2399_v40  ;;  %v2401_v45 = vpop.permute.xlu0 %607 }
  0xfd   : > { %2998 = vst [vmem:[#allocation11_spill] sm:$0xff] %v2401_v45  ;;  %1275 = vrot.lane.b32.xlu1 %v1270_v32, %s2037_s24  ;;  %v1354_v32 = vmul.f32 %v1352_v17, %v2117_v2 }
  0xfe   : > { %1273 = vrot.lane.b32.xlu0 %v1269_v33, %s2037_s24  ;;  %v1353_v33 = vmul.f32 %v1352_v17, %v2114_v1 }
  0xff   : > { %v2409_v59 = vpop.permute.xlu1 %629  ;;  %v1899_v54 = vrot.slane %v1354_v32, 9 }
 0x100   : > { %2999 = vst [vmem:[#allocation12_spill] sm:$0xff] %v2409_v59  ;;  %v2411_v60 = vpop.permute.xlu0 %627  ;;  %v1898_v61 = vrot.slane %v1353_v33, 9  ;;  %v1394_v33 = vmul.f32 %v1392_v10, %v2117_v2 }
 0x101   : > { %3000 = vst [vmem:[#allocation13_spill] sm:$0xff] %v2411_v60  ;;  %1303 = vrot.lane.b32.xlu1 %v1890_v46, %s2031_s8 }
 0x102   : > { %1301 = vrot.lane.b32.xlu0 %v1889_v47, %s2031_s8 }
 0x103   : > { %v2419_v18 = vpop.permute.xlu1 %649 }
 0x104   : > { %3001 = vst [vmem:[#allocation14_spill] sm:$0xff] %v2419_v18  ;;  %v2421_v19 = vpop.permute.xlu0 %647 }
 0x105   : > { %3002 = vst [vmem:[#allocation15_spill] sm:$0xff] %v2421_v19  ;;  %1323 = vrot.lane.b32.xlu1 %v1893_v6, %s2030_s7  ;;  %v1373_v6 = vmul.f32 %v1372_v38, %v2114_v1  ;;  %v1393_v38 = vmul.f32 %v1392_v10, %v2114_v1  ;;  %v1905_v10 = vrot.slane %v1394_v33, 9 }
 0x106   : > { %1321 = vrot.lane.b32.xlu0 %v1892_v9, %s2030_s7 }
 0x107   : > { %v670_v39 = vpop.permute.xlu1 %669  ;;  %v1901_v32 = vrot.slane %v1373_v6, 9 }
 0x108   : > { %v668_v46 = vpop.permute.xlu0 %667  ;;  %v672_v47 = vrot.slane %v670_v39, 4 }
 0x109   : > { %v671_v52 = vrot.slane %v668_v46, 4  ;;  %1343 = vrot.lane.b32.xlu1 %v1896_v24, %s2032_s11  ;;  %v681_v24 = vstv %s2423_s17  ;;  %s2924_s17 = sld [smem:[#allocation4]] }
 0x10a   : > { %1341 = vrot.lane.b32.xlu0 %v1895_v31, %s2032_s11  ;;  %v1902_v31 = vrot.slane %v1374_v53, 9 }
 0x10b   : > { %v673_v9 = vsel %vm216_vm0, %v671_v52, %v672_v47  ;;  %v693_v39 = vpop.permute.xlu1 %692  ;;  %v1412_v47 = vstv %s2430_s19  ;;  %v682_v52 = vmul.f32 %v681_v24, %v2114_v1  ;;  %s2948_s19 = sld [smem:[#allocation4 + $0x1]] }
 0x10c   : > { %v2441_v17 = vsel %vm337_vm1, %v668_v46, %v673_v9  ;;  %v691_v19 = vpop.permute.xlu0 %690  ;;  %v695_v18 = vrot.slane %v693_v39, 4 }
 0x10d   : > { %3003 = vst [vmem:[#allocation16_spill] sm:$0xff] %v2441_v17  ;;  %v694_v60 = vrot.slane %v691_v19, 4  ;;  %1363 = vrot.lane.b32.xlu1 %v1899_v54, %s2033_s15  ;;  %v1904_v17 = vrot.slane %v1393_v38, 9 }
 0x10e   : > { %1361 = vrot.lane.b32.xlu0 %v1898_v61, %s2033_s15  ;;  %v1414_v61 = vmul.f32 %v1412_v47, %v2117_v2 }
 0x10f   : > { %v696_v46 = vsel %vm216_vm0, %v694_v60, %v695_v18  ;;  %v709_v9 = vpop.permute.xlu1 %708  ;;  %v1413_v60 = vmul.f32 %v1412_v47, %v2114_v1  ;;  %v1432_v18 = vstv %s2438_s21  ;;  %s2960_s21 = sld [smem:[#allocation4 + $0x2]] }
 0x110   : > { %v697_v53 = vsel %vm218_vm2, %v691_v19, %v696_v46  ;;  %v707_v54 = vpop.permute.xlu0 %706  ;;  %v711_v39 = vrot.slane %v709_v9, 4  ;;  %v1908_v40 = vrot.slane %v1414_v61, 9  ;;  %v1434_v38 = vmul.f32 %v1432_v18, %v2117_v2 }
 0x111   : > { %v710_v6 = vrot.slane %v707_v54, 4  ;;  %1383 = vrot.lane.b32.xlu1 %v1902_v31, %s2034_s18  ;;  %v699_v24 = vadd.f32 %v697_v53, %v682_v52  ;;  %v1907_v33 = vrot.slane %v1413_v60, 9  ;;  %v1433_v47 = vmul.f32 %v1432_v18, %v2114_v1 }
 0x112   : > { %1381 = vrot.lane.b32.xlu0 %v1901_v32, %s2034_s18  ;;  %v1460_v53 = vstv %s2450_s23  ;;  %s1941_s23 = sshll.u32 %s3016_s13, 3 }
 0x113   : > { %v712_v19 = vsel %vm216_vm0, %v710_v6, %v711_v39  ;;  %v725_v46 = vpop.permute.xlu1 %724  ;;  %v1910_v60 = vrot.slane %v1433_v47, 9  ;;  %v1462_v18 = vmul.f32 %v1460_v53, %v2117_v2 }
 0x114   : > { %v723_v9 = vpop.permute.xlu0 %722  ;;  %v713_v59 = vsel %vm235_vm3, %v707_v54, %v712_v19  ;;  %v727_v45 = vrot.slane %v725_v46, 4  ;;  %v1480_v19 = vstv %s2459_s25 }
 0x115   : > { %v726_v31 = vrot.slane %v723_v9, 4  ;;  %v715_v32 = vadd.f32 %v713_v59, %v699_v24  ;;  %1403 = vrot.lane.b32.xlu1 %v1905_v10, %s2035_s20 }
 0x116   : > { %1401 = vrot.lane.b32.xlu0 %v1904_v17, %s2035_s20  ;;  %v1911_v17 = vrot.slane %v1434_v38, 9  ;;  %v2486_v38 = vld [vmem:[%s2111_s5 + $0x8] sm:$0x7] }
 0x117   : > { %v728_v52 = vsel %vm216_vm0, %v726_v31, %v727_v45  ;;  %v741_v39 = vpop.permute.xlu1 %740  ;;  %v1461_v45 = vmul.f32 %v1460_v53, %v2114_v1  ;;  %v1916_v1 = vrot.slane %v1462_v18, 10  ;;  %v1482_v47 = vmul.f32 %v2486_v38, %v1480_v19 }
 0x118   : > { %v729_v54 = vsel %vm252_vm4, %v723_v9, %v728_v52  ;;  %v739_v59 = vpop.permute.xlu0 %738  ;;  %v743_v6 = vrot.slane %v741_v39, 4  ;;  %v2490_v52 = vld [vmem:[%s2111_s5] sm:$0x77]  ;;  %v1029_v39 = vstv %s2469_s26  ;;  %s2504_s5 = sld [smem:[#allocation2 + $0x4c]] }
 0x119   : > { %v731_v61 = vadd.f32 %v729_v54, %v715_v32  ;;  %v742_v10 = vrot.slane %v739_v59, 4  ;;  %1423 = vrot.lane.b32.xlu1 %v1908_v40, %s2036_s22  ;;  %v1481_v53 = vmul.f32 %v2490_v52, %v1480_v19  ;;  %v1919_v18 = vrot.slane %v1482_v47, 10 }
 0x11a   : > { %1421 = vrot.lane.b32.xlu0 %v1907_v33, %s2036_s22  ;;  %v1915_v33 = vrot.slane %v1461_v45, 10  ;;  %v1030_v19 = vmul.f32 %v2490_v52, %v1029_v39 }
 0x11b   : > { %v744_v24 = vsel %vm216_vm0, %v742_v10, %v743_v6  ;;  %v757_v9 = vpop.permute.xlu1 %756  ;;  %v1918_v45 = vrot.slane %v1481_v53, 10 }
 0x11c   : > { %v745_v46 = vsel %vm269_vm5, %v739_v59, %v744_v24  ;;  %v755_v40 = vpop.permute.xlu0 %754  ;;  %v759_v32 = vrot.slane %v757_v9, 4  ;;  %v1031_v24 = vmul.f32 %v2486_v38, %v1029_v39  ;;  %v1500_v9 = vstv %s2478_s27  ;;  %s197_s27 = scalar_lea.vmem %s2981_s3, %s1941_s23 }
 0x11d   : > { %v747_v31 = vadd.f32 %v745_v46, %v731_v61  ;;  %v758_v2 = vrot.slane %v755_v40, 4  ;;  %1443 = vrot.lane.b32.xlu1 %v1911_v17, %s2037_s24  ;;  %v1502_v39 = vmul.f32 %v2486_v38, %v1500_v9 }
 0x11e   : > { %1441 = vrot.lane.b32.xlu0 %v1910_v60, %s2037_s24  ;;  %v1860_v53 = vrot.slane %v1031_v24, 10 }
 0x11f   : > { %v760_v54 = vsel %vm216_vm0, %v758_v2, %v759_v32  ;;  %v773_v61 = vpop.permute.xlu1 %772  ;;  %v813_v2 = vstv %s2481_s28 }
 0x120   : > { %v761_v59 = vsel %vm286_vm6, %v755_v40, %v760_v54  ;;  %v771_v6 = vpop.permute.xlu0 %770  ;;  %v775_v17 = vrot.slane %v773_v61, 4  ;;  %v1859_v54 = vrot.slane %v1030_v19, 10 }
 0x121   : > { %v763_v10 = vadd.f32 %v761_v59, %v747_v31  ;;  %v774_v60 = vrot.slane %v771_v6, 4  ;;  %1471 = vrot.lane.b32.xlu1 %v1916_v1, %s2031_s8  ;;  %v1501_v59 = vmul.f32 %v2490_v52, %v1500_v9 }
 0x122   : > { %1469 = vrot.lane.b32.xlu0 %v1915_v33, %s2031_s8  ;;  %s2515_s8 = sld [smem:[#allocation2 + $0x32]] }
 0x123   : > { %v776_v46 = vsel %vm216_vm0, %v774_v60, %v775_v17  ;;  %v789_v31 = vpop.permute.xlu1 %788  ;;  %v1049_v17 = vstv %s2495_s29  ;;  %v1921_v9 = vrot.slane %v1501_v59, 10 }
 0x124   : > { %v777_v40 = vsel %vm303_vm7, %v771_v6, %v776_v46  ;;  %v787_v32 = vpop.permute.xlu0 %786  ;;  %v791_v33 = vrot.slane %v789_v31, 4  ;;  %v814_v6 = vmul.f32 %v2490_v52, %v813_v2  ;;  %v1922_v46 = vrot.slane %v1502_v39, 10 }
 0x125   : > { %v779_v1 = vadd.f32 %v777_v40, %v763_v10  ;;  %v790_v47 = vrot.slane %v787_v32, 4  ;;  %1491 = vrot.lane.b32.xlu1 %v1919_v18, %s2030_s7  ;;  %v1051_v40 = vmul.f32 %v2486_v38, %v1049_v17  ;;  %v1050_v31 = vmul.f32 %v2490_v52, %v1049_v17 }
 0x126   : > { %1489 = vrot.lane.b32.xlu0 %v1918_v45, %s2030_s7  ;;  %s2524_s7 = sld [smem:[#allocation2 + $0x4d]] }
 0x127   : > { %v792_v61 = vsel %vm216_vm0, %v790_v47, %v791_v33  ;;  %v805_v60 = vpop.permute.xlu1 %804  ;;  %v1825_v33 = vrot.slane %v814_v6, 9  ;;  %v1520_v47 = vstv %s2504_s5  ;;  %v1863_v39 = vrot.slane %v1051_v40, 10 }
 0x128   : > { %v793_v10 = vsel %vm320_vm8, %v787_v32, %v792_v61  ;;  %v803_v18 = vpop.permute.xlu0 %802  ;;  %v807_v24 = vrot.slane %v805_v60, 4  ;;  %v1862_v59 = vrot.slane %v1050_v31, 10  ;;  %v1522_v17 = vmul.f32 %v2486_v38, %v1520_v47 }
 0x129   : > { %v795_v45 = vadd.f32 %v793_v10, %v779_v1  ;;  %v806_v19 = vrot.slane %v803_v18, 4  ;;  %1040 = vrot.lane.b32.xlu1 %v1860_v53, %s2032_s11  ;;  %v1521_v6 = vmul.f32 %v2490_v52, %v1520_v47 }
 0x12a   : > { %1038 = vrot.lane.b32.xlu0 %v1859_v54, %s2032_s11  ;;  %v1925_v40 = vrot.slane %v1522_v17, 10 }
 0x12b   : > { %v808_v2 = vsel %vm216_vm0, %v806_v19, %v807_v24  ;;  %v833_v1 = vpop.permute.xlu1 %832  ;;  %v1924_v31 = vrot.slane %v1521_v6, 10 }
 0x12c   : > { %v809_v32 = vsel %vm337_vm1, %v803_v18, %v808_v2  ;;  %v831_v61 = vpop.permute.xlu0 %830  ;;  %v835_v10 = vrot.slane %v833_v1, 4  ;;  %v1069_v18 = vstv %s2515_s8 }
 0x12d   : > { %v811_v53 = vadd.f32 %v809_v32, %v795_v45  ;;  %v834_v54 = vrot.slane %v831_v61, 4  ;;  %1511 = vrot.lane.b32.xlu1 %v1922_v46, %s2032_s11  ;;  %v1070_v47 = vmul.f32 %v2490_v52, %v1069_v18 }
 0x12e   : > { %1509 = vrot.lane.b32.xlu0 %v1921_v9, %s2032_s11  ;;  %s2542_s11 = sld [smem:[#allocation2 + $0x4e]] }
 0x12f   : > { %v819_v60 = vadd.f32 %v1825_v33, %v811_v53  ;;  %v836_v24 = vsel %vm216_vm0, %v834_v54, %v835_v10  ;;  %v853_v19 = vpop.permute.xlu1 %852  ;;  %v1071_v33 = vmul.f32 %v2486_v38, %v1069_v18  ;;  %v1540_v53 = vstv %s2524_s7 }
 0x130   : > { %v837_v45 = vsel %vm218_vm2, %v831_v61, %v836_v24  ;;  %v851_v2 = vpop.permute.xlu0 %850  ;;  %v855_v32 = vrot.slane %v853_v19, 4  ;;  %v1865_v17 = vrot.slane %v1070_v47, 10  ;;  %v1542_v6 = vmul.f32 %v2486_v38, %v1540_v53 }
 0x131   : > { %v839_v46 = vadd.f32 %v837_v45, %v819_v60  ;;  %v854_v9 = vrot.slane %v851_v2, 4  ;;  %1060 = vrot.lane.b32.xlu1 %v1863_v39, %s2033_s15  ;;  %v1541_v18 = vmul.f32 %v2490_v52, %v1540_v53  ;;  %v1089_v19 = vstv %s2533_s30 }
 0x132   : > { %1058 = vrot.lane.b32.xlu0 %v1862_v59, %s2033_s15  ;;  %v1866_v59 = vrot.slane %v1071_v33, 10  ;;  %v1091_v47 = vmul.f32 %v2486_v38, %v1089_v19  ;;  %v1090_v53 = vmul.f32 %v2490_v52, %v1089_v19 }
 0x133   : > { %v856_v1 = vsel %vm216_vm0, %v854_v9, %v855_v32  ;;  %v873_v10 = vpop.permute.xlu1 %872  ;;  %v1927_v33 = vrot.slane %v1541_v18, 10 }
 0x134   : > { %v857_v61 = vsel %vm235_vm3, %v851_v2, %v856_v1  ;;  %v871_v54 = vpop.permute.xlu0 %870  ;;  %v875_v39 = vrot.slane %v873_v10, 4  ;;  %v1560_v10 = vstv %s2542_s11  ;;  %v1868_v18 = vrot.slane %v1090_v53, 10 }
 0x135   : > { %v859_v60 = vadd.f32 %v857_v61, %v839_v46  ;;  %v874_v24 = vrot.slane %v871_v54, 4  ;;  %1531 = vrot.lane.b32.xlu1 %v1925_v40, %s2033_s15  ;;  %v1561_v19 = vmul.f32 %v2490_v52, %v1560_v10 }
 0x136   : > { %1529 = vrot.lane.b32.xlu0 %v1924_v31, %s2033_s15  ;;  %v1928_v31 = vrot.slane %v1542_v6, 10  ;;  %s2560_s15 = sld [smem:[#allocation2 + $0x4f]]  ;;  %v1869_v6 = vrot.slane %v1091_v47, 10 }
 0x137   : > { %v876_v45 = vsel %vm216_vm0, %v874_v24, %v875_v39  ;;  %v893_v46 = vpop.permute.xlu1 %892  ;;  %v1930_v53 = vrot.slane %v1561_v19, 10 }
 0x138   : > { %v877_v2 = vsel %vm252_vm4, %v871_v54, %v876_v45  ;;  %v891_v32 = vpop.permute.xlu0 %890  ;;  %v895_v40 = vrot.slane %v893_v46, 4  ;;  %v1562_v45 = vmul.f32 %v2486_v38, %v1560_v10  ;;  %v1109_v46 = vstv %s2551_s4 }
 0x139   : > { %v879_v9 = vadd.f32 %v877_v2, %v859_v60  ;;  %v894_v1 = vrot.slane %v891_v32, 4  ;;  %1080 = vrot.lane.b32.xlu1 %v1866_v59, %s2034_s18  ;;  %v1110_v10 = vmul.f32 %v2490_v52, %v1109_v46 }
 0x13a   : > { %1078 = vrot.lane.b32.xlu0 %v1865_v17, %s2034_s18  ;;  %v1931_v47 = vrot.slane %v1562_v45, 10 }
 0x13b   : > { %v896_v61 = vsel %vm216_vm0, %v894_v1, %v895_v40  ;;  %v913_v60 = vpop.permute.xlu1 %912  ;;  %v1871_v19 = vrot.slane %v1110_v10, 10 }
 0x13c   : > { %v897_v54 = vsel %vm269_vm5, %v891_v32, %v896_v61  ;;  %v911_v39 = vpop.permute.xlu0 %910  ;;  %v915_v59 = vrot.slane %v913_v60, 4  ;;  %v1111_v61 = vmul.f32 %v2486_v38, %v1109_v46  ;;  %v1580_v60 = vstv %s2560_s15 }
 0x13d   : > { %v899_v24 = vadd.f32 %v897_v54, %v879_v9  ;;  %v914_v17 = vrot.slane %v911_v39, 4  ;;  %1551 = vrot.lane.b32.xlu1 %v1928_v31, %s2034_s18  ;;  %v1582_v46 = vmul.f32 %v2486_v38, %v1580_v60 }
 0x13e   : > { %1549 = vrot.lane.b32.xlu0 %v1927_v33, %s2034_s18  ;;  %s2580_s18 = sld [smem:[#allocation2 + $0x50]]  ;;  %v1872_v45 = vrot.slane %v1111_v61, 10 }
 0x13f   : > { %v916_v2 = vsel %vm216_vm0, %v914_v17, %v915_v59  ;;  %v933_v9 = vpop.permute.xlu1 %932  ;;  %v981_v17 = vstv %s2563_s6 }
 0x140   : > { %v917_v32 = vsel %vm286_vm6, %v911_v39, %v916_v2  ;;  %v931_v40 = vpop.permute.xlu0 %930  ;;  %v935_v31 = vrot.slane %v933_v9, 4 }
 0x141   : > { %v919_v1 = vadd.f32 %v917_v32, %v899_v24  ;;  %v934_v33 = vrot.slane %v931_v40, 4  ;;  %1100 = vrot.lane.b32.xlu1 %v1869_v6, %s2035_s20  ;;  %v1581_v32 = vmul.f32 %v2490_v52, %v1580_v60 }
 0x142   : > { %1098 = vrot.lane.b32.xlu0 %v1868_v18, %s2035_s20 }
 0x143   : > { %v936_v54 = vsel %vm216_vm0, %v934_v33, %v935_v31  ;;  %v953_v24 = vpop.permute.xlu1 %952  ;;  %v1129_v31 = vstv %s2571_s9  ;;  %v1933_v61 = vrot.slane %v1581_v32, 10 }
 0x144   : > { %v937_v39 = vsel %vm303_vm7, %v931_v40, %v936_v54  ;;  %v951_v59 = vpop.permute.xlu0 %950  ;;  %v955_v2 = vrot.slane %v953_v24, 4  ;;  %v982_v40 = vmul.f32 %v2490_v52, %v981_v17  ;;  %v1131_v10 = vmul.f32 %v2486_v38, %v1129_v31 }
 0x145   : > { %v939_v6 = vadd.f32 %v937_v39, %v919_v1  ;;  %v954_v18 = vrot.slane %v951_v59, 4  ;;  %1571 = vrot.lane.b32.xlu1 %v1931_v47, %s2035_s20  ;;  %v1130_v60 = vmul.f32 %v2490_v52, %v1129_v31 }
 0x146   : > { %1569 = vrot.lane.b32.xlu0 %v1930_v53, %s2035_s20  ;;  %v1934_v53 = vrot.slane %v1582_v46, 10  ;;  %s2599_s20 = sld [smem:[#allocation2 + $0x36]] }
 0x147   : > { %v956_v9 = vsel %vm216_vm0, %v954_v18, %v955_v2  ;;  %v973_v33 = vpop.permute.xlu1 %972  ;;  %v1851_v2 = vrot.slane %v982_v40, 10  ;;  %v1600_v18 = vstv %s2580_s18  ;;  %v1874_v46 = vrot.slane %v1130_v60, 10 }
 0x148   : > { %v957_v1 = vsel %vm320_vm8, %v951_v59, %v956_v9  ;;  %v971_v54 = vpop.permute.xlu0 %970  ;;  %v975_v47 = vrot.slane %v973_v33, 4  ;;  %v1602_v32 = vmul.f32 %v2486_v38, %v1600_v18  ;;  %v1601_v40 = vmul.f32 %v2490_v52, %v1600_v18 }
 0x149   : > { %v959_v39 = vadd.f32 %v957_v1, %v939_v6  ;;  %v974_v24 = vrot.slane %v971_v54, 4  ;;  %1120 = vrot.lane.b32.xlu1 %v1872_v45, %s2036_s22 }
 0x14a   : > { %1118 = vrot.lane.b32.xlu0 %v1871_v19, %s2036_s22  ;;  %v1875_v19 = vrot.slane %v1131_v10, 10 }
 0x14b   : > { %v976_v17 = vsel %vm216_vm0, %v974_v24, %v975_v47  ;;  %v1001_v9 = vpop.permute.xlu1 %1000 }
 0x14c   : > { %v977_v59 = vsel %vm337_vm1, %v971_v54, %v976_v17  ;;  %v999_v6 = vpop.permute.xlu0 %998  ;;  %v1003_v45 = vrot.slane %v1001_v9, 4 }
 0x14d   : > { %v979_v1 = vadd.f32 %v977_v59, %v959_v39  ;;  %v1002_v33 = vrot.slane %v999_v6, 4  ;;  %1591 = vrot.lane.b32.xlu1 %v1934_v53, %s2036_s22  ;;  %v1937_v53 = vrot.slane %v1602_v32, 10 }
 0x14e   : > { %1589 = vrot.lane.b32.xlu0 %v1933_v61, %s2036_s22  ;;  %v1936_v61 = vrot.slane %v1601_v40, 10  ;;  %s200_s22 = sld [smem:[#allocation2]] }
 0x14f   : > { %v987_v31 = vadd.f32 %v1851_v2, %v979_v1  ;;  %v1004_v54 = vsel %vm216_vm0, %v1002_v33, %v1003_v45  ;;  %v1021_v24 = vpop.permute.xlu1 %1020  ;;  %v1152_v2 = vstv %s2599_s20 }
 0x150   : > { %v1005_v47 = vsel %vm218_vm2, %v999_v6, %v1004_v54  ;;  %v1019_v39 = vpop.permute.xlu0 %1018  ;;  %v1023_v59 = vrot.slane %v1021_v24, 4  ;;  %v1153_v33 = vmul.f32 %v2490_v52, %v1152_v2 }
 0x151   : > { %v1007_v17 = vadd.f32 %v1005_v47, %v987_v31  ;;  %v1022_v9 = vrot.slane %v1019_v39, 4  ;;  %1140 = vrot.lane.b32.xlu1 %v1875_v19, %s2037_s24 }
 0x152   : > { %1138 = vrot.lane.b32.xlu0 %v1874_v46, %s2037_s24 }
 0x153   : > { %v1024_v38 = vsel %vm216_vm0, %v1022_v9, %v1023_v59  ;;  %v1164_v60 = vpop.permute.xlu1 %1163 }
 0x154   : > { %v1025_v10 = vsel %vm235_vm3, %v1019_v39, %v1024_v38  ;;  %v1162_v18 = vpop.permute.xlu0 %1161  ;;  %v1166_v6 = vrot.slane %v1164_v60, 4 }
 0x155   : > { %v2612_v1 = vadd.f32 %v1025_v10, %v1007_v17  ;;  %v1165_v45 = vrot.slane %v1162_v18, 4  ;;  %1611 = vrot.lane.b32.xlu1 %v1937_v53, %s2037_s24 }
 0x156   : > { %1609 = vrot.lane.b32.xlu0 %v1936_v61, %s2037_s24  ;;  %s1763_s24 = sld [smem:[#allocation2 + $0x9]] }
 0x157   : > { %3004 = vst [vmem:[#allocation17_spill] sm:$0xff] %v2612_v1  ;;  %v1167_v19 = vsel %vm216_vm0, %v1165_v45, %v1166_v6  ;;  %v1180_v32 = vpop.permute.xlu1 %1179 }
 0x158   : > { %v1168_v46 = vsel %vm218_vm2, %v1162_v18, %v1167_v19  ;;  %v1178_v40 = vpop.permute.xlu0 %1177  ;;  %v1182_v31 = vrot.slane %v1180_v32, 4 }
 0x159   : > { %v1181_v54 = vrot.slane %v1178_v40, 4  ;;  %v1170_v47 = vadd.f32 %v1168_v46, %v1153_v33  ;;  %v215_v46 = vrot.slane %v2247_v8, 4 }
 0x15b   : > { %v1183_v24 = vsel %vm216_vm0, %v1181_v54, %v1182_v31  ;;  %v1196_v17 = vpop.permute.xlu1 %1195  ;;  %v214_v31 = vrot.slane %v2239_v0, 4  ;;  %v201_v54 = vstv %s200_s22 }
 0x15c   : > { %v1184_v39 = vsel %vm235_vm3, %v1178_v40, %v1183_v24  ;;  %v1194_v59 = vpop.permute.xlu0 %1193  ;;  %v1198_v53 = vrot.slane %v1196_v17, 4  ;;  %v233_v17 = vrot.slane %v2245_v7, 4  ;;  %v267_v7 = vrot.slane %v2263_v21, 4 }
 0x15d   : > { %v1186_v9 = vadd.f32 %v1184_v39, %v1170_v47  ;;  %v1197_v61 = vrot.slane %v1194_v59, 4  ;;  %v217_v47 = vsel %vm216_vm0, %v214_v31, %v215_v46  ;;  %v301_v21 = vrot.slane %v2279_v35, 4 }
 0x15e   : > { %v219_v8 = vsel %vm218_vm2, %v2239_v0, %v217_v47  ;;  %v284_v0 = vrot.slane %v2271_v28, 4  ;;  %v283_v47 = vrot.slane %v2273_v29, 4 }
 0x15f   : > { %v1199_v38 = vsel %vm216_vm0, %v1197_v61, %v1198_v53  ;;  %v2623_v60 = vpop.permute.xlu1 %1211  ;;  %v250_v53 = vrot.slane %v2255_v14, 4  ;;  %v249_v61 = vrot.slane %v2257_v15, 4 }
 0x160   : > { %v1200_v10 = vsel %vm252_vm4, %v1194_v59, %v1199_v38  ;;  %v2625_v2 = vpop.permute.xlu0 %1209  ;;  %v202_v59 = vmul.f32 %v2490_v52, %v201_v54  ;;  %v266_v54 = vrot.slane %v2265_v22, 4 }
 0x161   : > { %v2627_v18 = vadd.f32 %v1200_v10, %v1186_v9  ;;  %v232_v9 = vrot.slane %v2237_v63, 4  ;;  %v251_v1 = vsel %vm216_vm0, %v249_v61, %v250_v53  ;;  %v318_v53 = vrot.slane %v2287_v42, 4 }
 0x162   : > { %v221_v31 = vadd.f32 %v219_v8, %v202_v59  ;;  %v268_v59 = vsel %vm216_vm0, %v266_v54, %v267_v7  ;;  %v300_v8 = vrot.slane %v2281_v36, 4  ;;  %v253_v28 = vsel %vm252_vm4, %v2257_v15, %v251_v1 }
 0x163   : > { %v2629_v6 = vpop.permute.xlu1 %1227  ;;  %v234_v46 = vsel %vm216_vm0, %v232_v9, %v233_v17  ;;  %v285_v9 = vsel %vm216_vm0, %v283_v47, %v284_v0  ;;  %v270_v61 = vsel %vm269_vm5, %v2265_v22, %v268_v59  ;;  %v335_v54 = vrot.slane %v2295_v49, 4 }
 0x164   : > { %v2631_v45 = vpop.permute.xlu0 %1225  ;;  %v236_v14 = vsel %vm235_vm3, %v2237_v63, %v234_v46  ;;  %v317_v63 = vrot.slane %v2289_v43, 4  ;;  %v302_v35 = vsel %vm216_vm0, %v300_v8, %v301_v21  ;;  %v334_v15 = vrot.slane %v2297_v50, 4 }
 0x165   : > { %v238_v17 = vadd.f32 %v236_v14, %v221_v31  ;;  %v287_v1 = vsel %vm286_vm6, %v2273_v29, %v285_v9  ;;  %v304_v22 = vsel %vm303_vm7, %v2281_v36, %v302_v35  ;;  %v342_v47 = vstv %s1763_s24 }
 0x166   : > { %v319_v0 = vsel %vm216_vm0, %v317_v63, %v318_v53  ;;  %v336_v21 = vsel %vm216_vm0, %v334_v15, %v335_v54  ;;  %v343_v29 = vmul.f32 %v2490_v52, %v342_v47  ;;  %v364_v63 = vrot.slane %v2303_v56, 4 }
 0x167   : > { %v2633_v33 = vpop.permute.xlu1 %1243  ;;  %v255_v7 = vadd.f32 %v253_v28, %v238_v17  ;;  %v321_v49 = vsel %vm320_vm8, %v2289_v43, %v319_v0  ;;  %v338_v28 = vsel %vm337_vm1, %v2297_v50, %v336_v21  ;;  %v384_v54 = vrot.slane %v2311_v3, 4 }
 0x168   : > { %v2635_v19 = vpop.permute.xlu0 %1241  ;;  %v1764_v35 = vrot.slane %v343_v29, 9  ;;  %v383_v43 = vrot.slane %v2313_v4, 4  ;;  %v403_v0 = vrot.slane %v2321_v13, 4  ;;  %v1214_v29 = vrot.slane %v2623_v60, 4 }
 0x169   : > { %v272_v42 = vadd.f32 %v270_v61, %v255_v7  ;;  %v363_v61 = vrot.slane %v2305_v57, 4 }
 0x16a   : > { %v385_v56 = vsel %vm216_vm0, %v383_v43, %v384_v54  ;;  %v463_v43 = vrot.slane %v2343_v37, 4 }
 0x16b   : > { %v2638_v32 = vpop.permute.xlu1 %1259  ;;  %v289_v17 = vadd.f32 %v287_v1, %v272_v42  ;;  %v365_v50 = vsel %vm216_vm0, %v363_v61, %v364_v63  ;;  %v404_v42 = vrot.slane %v2319_v12, 4  ;;  %v386_v12 = vsel %vm235_vm3, %v2313_v4, %v385_v56 }
 0x16c   : > { %v2640_v40 = vpop.permute.xlu0 %1257  ;;  %v366_v47 = vsel %vm218_vm2, %v2305_v57, %v365_v50  ;;  %v444_v57 = vrot.slane %v2333_v27, 4  ;;  %v443_v63 = vrot.slane %v2335_v30, 4  ;;  %v464_v27 = vrot.slane %v2341_v34, 4 }
 0x16d   : > { %v306_v8 = vadd.f32 %v304_v22, %v289_v17  ;;  %v405_v21 = vsel %vm216_vm0, %v403_v0, %v404_v42  ;;  %v483_v56 = vrot.slane %v2351_v44, 4 }
 0x16e   : > { %v406_v61 = vsel %vm252_vm4, %v2321_v13, %v405_v21  ;;  %v1246_v13 = vrot.slane %v2633_v33, 4  ;;  %v445_v0 = vsel %vm216_vm0, %v443_v63, %v444_v57  ;;  %v1262_v21 = vrot.slane %v2638_v32, 4 }
 0x16f   : > { %v2644_v24 = vpop.permute.xlu1 %1275  ;;  %v323_v53 = vadd.f32 %v321_v49, %v306_v8  ;;  %v424_v49 = vrot.slane %v2327_v20, 4  ;;  %v423_v8 = vrot.slane %v2329_v23, 4  ;;  %v1230_v20 = vrot.slane %v2629_v6, 4 }
 0x170   : > { %v2646_v39 = vpop.permute.xlu0 %1273  ;;  %v1245_v6 = vrot.slane %v2635_v19, 4 }
 0x171   : > { %v340_v7 = vadd.f32 %v338_v28, %v323_v53  ;;  %v1213_v28 = vrot.slane %v2625_v2, 4  ;;  %v425_v54 = vsel %vm216_vm0, %v423_v8, %v424_v49  ;;  %v1261_v49 = vrot.slane %v2640_v40, 4 }
 0x172   : > { %v426_v34 = vsel %vm269_vm5, %v2329_v23, %v425_v54  ;;  %v1247_v32 = vsel %vm216_vm0, %v1245_v6, %v1246_v13  ;;  %v1277_v57 = vrot.slane %v2646_v39, 4 }
 0x173   : > { %v2655_v38 = vpop.permute.xlu1 %1303  ;;  %v348_v22 = vadd.f32 %v1764_v35, %v340_v7  ;;  %v1229_v7 = vrot.slane %v2631_v45, 4  ;;  %v1215_v50 = vsel %vm216_vm0, %v1213_v28, %v1214_v29  ;;  %v503_v29 = vrot.slane %v2359_v51, 4 }
 0x174   : > { %v2657_v10 = vpop.permute.xlu0 %1301  ;;  %v1216_v23 = vsel %vm269_vm5, %v2625_v2, %v1215_v50  ;;  %v446_v28 = vsel %vm286_vm6, %v2335_v30, %v445_v0  ;;  %v1263_v30 = vsel %vm216_vm0, %v1261_v49, %v1262_v21  ;;  %v1284_v50 = vstv %s2747_s14 }
 0x175   : > { %v368_v53 = vadd.f32 %v366_v47, %v348_v22  ;;  %v484_v22 = vrot.slane %v2349_v41, 4  ;;  %v1231_v47 = vsel %vm216_vm0, %v1229_v7, %v1230_v20  ;;  %v504_v41 = vrot.slane %v2357_v48, 4 }
 0x176   : > { %v510_v20 = vstv %s2734_s10  ;;  %v1232_v48 = vsel %vm286_vm6, %v2631_v45, %v1231_v47  ;;  %v1218_v7 = vadd.f32 %v1216_v23, %v2627_v18  ;;  %v531_v0 = vrot.slane %v2367_v58, 4 }
 0x177   : > { %v2667_v26 = vpop.permute.xlu1 %1323  ;;  %v388_v60 = vadd.f32 %v386_v12, %v368_v53  ;;  %v465_v12 = vsel %vm216_vm0, %v463_v43, %v464_v27  ;;  %v1278_v53 = vrot.slane %v2644_v24, 4  ;;  %v505_v27 = vsel %vm216_vm0, %v503_v29, %v504_v41 }
 0x178   : > { %v2669_v25 = vpop.permute.xlu0 %1321  ;;  %v466_v2 = vsel %vm303_vm7, %v2343_v37, %v465_v12  ;;  %v1248_v43 = vsel %vm303_vm7, %v2635_v19, %v1247_v32  ;;  %v511_v37 = vmul.f32 %v2490_v52, %v510_v20  ;;  %v1234_v13 = vadd.f32 %v1232_v48, %v1218_v7 }
 0x179   : > { %v408_v42 = vadd.f32 %v406_v61, %v388_v60  ;;  %v485_v61 = vsel %vm216_vm0, %v483_v56, %v484_v22  ;;  %v1279_v18 = vsel %vm216_vm0, %v1277_v57, %v1278_v53  ;;  %v1264_v22 = vsel %vm320_vm8, %v2640_v40, %v1263_v30 }
 0x17a   : > { %v486_v45 = vsel %vm320_vm8, %v2351_v44, %v485_v61  ;;  %v506_v19 = vsel %vm337_vm1, %v2359_v51, %v505_v27  ;;  %v1250_v56 = vadd.f32 %v1248_v43, %v1234_v13  ;;  %v1280_v49 = vsel %vm337_vm1, %v2646_v39, %v1279_v18 }
 0x17b   : > { %v2681_v46 = vpop.permute.xlu1 %1343  ;;  %v428_v63 = vadd.f32 %v426_v34, %v408_v42  ;;  %v532_v42 = vrot.slane %v2365_v55, 4  ;;  %v1285_v34 = vmul.f32 %v2490_v52, %v1284_v50  ;;  %v1306_v12 = vrot.slane %v2655_v38, 4 }
 0x17c   : > { %v2683_v31 = vpop.permute.xlu0 %1341  ;;  %v1266_v55 = vadd.f32 %v1264_v22, %v1250_v56  ;;  %v1305_v41 = vrot.slane %v2657_v10, 4  ;;  %v1790_v29 = vrot.slane %v511_v37, 10  ;;  %v1326_v32 = vrot.slane %v2667_v26, 4  ;;  %v3005_v56 = vld [vmem:[#allocation8_spill] sm:$0xff] }
 0x17d   : > { %v448_v24 = vadd.f32 %v446_v28, %v428_v63  ;;  %v533_v51 = vsel %vm216_vm0, %v531_v0, %v532_v42  ;;  %v1887_v28 = vrot.slane %v1285_v34, 9  ;;  %v1325_v53 = vrot.slane %v2669_v25, 4 }
 0x17e   : > { %v1282_v23 = vadd.f32 %v1280_v49, %v1266_v55  ;;  %v1307_v39 = vsel %vm216_vm0, %v1305_v41, %v1306_v12  ;;  %v1346_v38 = vrot.slane %v2681_v46, 4  ;;  %v1345_v61 = vrot.slane %v2683_v31, 4 }
 0x17f   : > { %v2693_v14 = vpop.permute.xlu1 %1363  ;;  %v468_v6 = vadd.f32 %v466_v2, %v448_v24  ;;  %v534_v48 = vsel %vm218_vm2, %v2367_v58, %v533_v51  ;;  %v552_v2 = vrot.slane %v2373_v62, 4  ;;  %v551_v26 = vrot.slane %v2375_v5, 4 }
 0x180   : > { %v2695_v59 = vpop.permute.xlu0 %1361  ;;  %v1290_v7 = vadd.f32 %v1887_v28, %v1282_v23  ;;  %v1327_v30 = vsel %vm216_vm0, %v1325_v53, %v1326_v32  ;;  %v1366_v24 = vrot.slane %v2693_v14, 4  ;;  %v572_v50 = vrot.slane %v2381_v11, 4  ;;  %v3007_v28 = vld [vmem:[#allocation10_spill] sm:$0xff]  ;;  %v3008_v32 = vld [vmem:[#allocation11_spill] sm:$0xff] }
 0x181   : > { %v488_v21 = vadd.f32 %v486_v45, %v468_v6  ;;  %v1365_v27 = vrot.slane %v2695_v59, 4  ;;  %v571_v45 = vrot.slane %v2383_v16, 4  ;;  %v1308_v58 = vsel %vm218_vm2, %v2657_v10, %v1307_v39 }
 0x182   : > { %v1347_v62 = vsel %vm216_vm0, %v1345_v61, %v1346_v38  ;;  %v553_v18 = vsel %vm216_vm0, %v551_v26, %v552_v2  ;;  %v1328_v6 = vsel %vm235_vm3, %v2669_v25, %v1327_v30  ;;  %v1310_v11 = vadd.f32 %v1308_v58, %v1290_v7  ;;  %v3009_v58 = vld [vmem:[#allocation12_spill] sm:$0xff] }
 0x183   : > { %v2703_v9 = vpop.permute.xlu1 %1383  ;;  %v508_v40 = vadd.f32 %v506_v19, %v488_v21  ;;  %v1367_v42 = vsel %vm216_vm0, %v1365_v27, %v1366_v24  ;;  %v573_v19 = vsel %vm216_vm0, %v571_v45, %v572_v50  ;;  %v592_v34 = vrot.slane %v3005_v56, 4  ;;  %v3006_v21 = vld [vmem:[#allocation9_spill] sm:$0xff] }
 0x184   : > { %v2705_v36 = vpop.permute.xlu0 %1381  ;;  %v1386_v37 = vrot.slane %v2703_v9, 4  ;;  %v591_v49 = vrot.slane %v3006_v21, 4  ;;  %v1348_v25 = vsel %vm252_vm4, %v2683_v31, %v1347_v62  ;;  %v1330_v55 = vadd.f32 %v1328_v6, %v1310_v11 }
 0x185   : > { %v516_v20 = vadd.f32 %v1790_v29, %v508_v40  ;;  %v1385_v13 = vrot.slane %v2705_v36, 4  ;;  %v554_v40 = vsel %vm235_vm3, %v2375_v5, %v553_v18  ;;  %v1368_v29 = vsel %vm269_vm5, %v2695_v59, %v1367_v42 }
 0x186   : > { %v612_v31 = vrot.slane %v3007_v28, 4  ;;  %v611_v53 = vrot.slane %v3008_v32, 4  ;;  %v1350_v39 = vadd.f32 %v1348_v25, %v1330_v55  ;;  %v574_v5 = vsel %vm252_vm4, %v2383_v16, %v573_v19 }
 0x187   : > { %v2711_v15 = vpop.permute.xlu1 %1403  ;;  %v536_v14 = vadd.f32 %v534_v48, %v516_v20  ;;  %v1387_v12 = vsel %vm216_vm0, %v1385_v13, %v1386_v37  ;;  %v593_v59 = vsel %vm216_vm0, %v591_v49, %v592_v34  ;;  %v1452_v26 = vstv %s2837_s16  ;;  %v3010_v37 = vld [vmem:[#allocation13_spill] sm:$0xff] }
 0x188   : > { %v2713_v1 = vpop.permute.xlu0 %1401  ;;  %v1406_v0 = vrot.slane %v2711_v15, 4  ;;  %v1370_v48 = vadd.f32 %v1368_v29, %v1350_v39  ;;  %v594_v27 = vsel %vm269_vm5, %v3006_v21, %v593_v59  ;;  %v613_v16 = vsel %vm216_vm0, %v611_v53, %v612_v31 }
 0x189   : > { %v1405_v10 = vrot.slane %v2713_v1, 4  ;;  %v556_v20 = vadd.f32 %v554_v40, %v536_v14  ;;  %v632_v62 = vrot.slane %v3009_v58, 4  ;;  %v631_v13 = vrot.slane %v3010_v37, 4 }
 0x18a   : > { %v1453_v14 = vmul.f32 %v2490_v52, %v1452_v26  ;;  %v614_v52 = vsel %vm286_vm6, %v3008_v32, %v613_v16  ;;  %v1623_v59 = vlaneseq }
 0x18b   : > { %v2721_v17 = vpop.permute.xlu1 %1423  ;;  %v576_v24 = vadd.f32 %v574_v5, %v556_v20 }
 0x18c   : > { %v2723_v3 = vpop.permute.xlu0 %1421  ;;  %v1426_v15 = vrot.slane %v2721_v17, 4  ;;  %v1407_v17 = vsel %vm216_vm0, %v1405_v10, %v1406_v0 }
 0x18d   : > { %v1425_v41 = vrot.slane %v2723_v3, 4  ;;  %v1408_v7 = vsel %vm303_vm7, %v2713_v1, %v1407_v17  ;;  %v596_v34 = vadd.f32 %v594_v27, %v576_v24 }
 0x18f   : > { %v2740_v35 = vpop.permute.xlu1 %1443  ;;  %v1427_v2 = vsel %vm216_vm0, %v1425_v41, %v1426_v15  ;;  %v1913_v41 = vrot.slane %v1453_v14, 10  ;;  %v616_v5 = vadd.f32 %v614_v52, %v596_v34  ;;  %v3013_v14 = vld [vmem:[#allocation17_spill] sm:$0xff] }
 0x190   : > { %v2742_v4 = vpop.permute.xlu0 %1441  ;;  %v1446_v51 = vrot.slane %v2740_v35, 4  ;;  %v1388_v35 = vsel %vm286_vm6, %v2705_v36, %v1387_v12  ;;  %v1428_v1 = vsel %vm320_vm8, %v2723_v3, %v1427_v2  ;;  %v3012_v12 = vld [vmem:[#allocation15_spill] sm:$0xff] }
 0x191   : > { %v1445_v23 = vrot.slane %v2742_v4, 4  ;;  %v1390_v50 = vadd.f32 %v1388_v35, %v1370_v48 }
 0x193   : > { %v2760_v33 = vpop.permute.xlu1 %1471  ;;  %v1447_v30 = vsel %vm216_vm0, %v1445_v23, %v1446_v51  ;;  %v1410_v18 = vadd.f32 %v1408_v7, %v1390_v50 }
 0x194   : > { %v2762_v8 = vpop.permute.xlu0 %1469  ;;  %v1448_v6 = vsel %vm337_vm1, %v2742_v4, %v1447_v30  ;;  %v1474_v11 = vrot.slane %v2760_v33, 4  ;;  %v633_v4 = vsel %vm216_vm0, %v631_v13, %v632_v62  ;;  %v3011_v33 = vld [vmem:[#allocation14_spill] sm:$0xff] }
 0x195   : > { %v1473_v42 = vrot.slane %v2762_v8, 4  ;;  %v1430_v3 = vadd.f32 %v1428_v1, %v1410_v18  ;;  %v652_v25 = vrot.slane %v3011_v33, 4  ;;  %v634_v20 = vsel %vm303_vm7, %v3010_v37, %v633_v4 }
 0x196   : > { %v636_v37 = vadd.f32 %v634_v20, %v616_v5  ;;  %v1624_v33 = vshrl.u32 %v1623_v59, 7  ;;  %v1149_v20 = vstv %s2948_s19 }
 0x197   : > { %v2782_v60 = vpop.permute.xlu1 %1491  ;;  %v1450_v15 = vadd.f32 %v1448_v6, %v1430_v3  ;;  %v1475_v40 = vsel %vm216_vm0, %v1473_v42, %v1474_v11 }
 0x198   : > { %v2784_v54 = vpop.permute.xlu0 %1489  ;;  %v1494_v0 = vrot.slane %v2782_v60, 4 }
 0x199   : > { %v1493_v10 = vrot.slane %v2784_v54, 4  ;;  %v1458_v48 = vadd.f32 %v1913_v41, %v1450_v15 }
 0x19b   : > { %v2801_v44 = vpop.permute.xlu1 %1040  ;;  %v1495_v29 = vsel %vm216_vm0, %v1493_v10, %v1494_v0 }
 0x19c   : > { %v2803_v47 = vpop.permute.xlu0 %1038  ;;  %v1043_v19 = vrot.slane %v2801_v44, 4  ;;  %v651_v44 = vrot.slane %v3012_v12, 4 }
 0x19d   : > { %v1042_v56 = vrot.slane %v2803_v47, 4 }
 0x19f   : > { %v2812_v57 = vpop.permute.xlu1 %1511  ;;  %v1044_v51 = vsel %vm216_vm0, %v1042_v56, %v1043_v19 }
 0x1a0   : > { %v2814_v63 = vpop.permute.xlu0 %1509  ;;  %v1514_v23 = vrot.slane %v2812_v57, 4  ;;  %v653_v57 = vsel %vm216_vm0, %v651_v44, %v652_v25  ;;  %v1045_v2 = vsel %vm252_vm4, %v2803_v47, %v1044_v51 }
 0x1a1   : > { %v1513_v28 = vrot.slane %v2814_v63, 4  ;;  %v654_v13 = vsel %vm320_vm8, %v3012_v12, %v653_v57  ;;  %v1047_v18 = vadd.f32 %v1045_v2, %v3013_v14  ;;  %v3014_v12 = vld [vmem:[#allocation16_spill] sm:$0xff] }
 0x1a2   : > { %v656_v4 = vadd.f32 %v654_v13, %v636_v37 }
 0x1a3   : > { %v2826_v43 = vpop.permute.xlu1 %1060  ;;  %v1515_v30 = vsel %vm216_vm0, %v1513_v28, %v1514_v23 }
 0x1a4   : > { %v2828_v46 = vpop.permute.xlu0 %1058  ;;  %v1063_v60 = vrot.slane %v2826_v43, 4  ;;  %v676_v44 = vadd.f32 %v3014_v12, %v656_v4 }
 0x1a5   : > { %v1062_v55 = vrot.slane %v2828_v46, 4 }
 0x1a7   : > { %v2845_v22 = vpop.permute.xlu1 %1531  ;;  %v1064_v35 = vsel %vm216_vm0, %v1062_v55, %v1063_v60 }
 0x1a8   : > { %v2847_v9 = vpop.permute.xlu0 %1529  ;;  %v1534_v31 = vrot.slane %v2845_v22, 4  ;;  %v1476_v22 = vsel %vm218_vm2, %v2762_v8, %v1475_v40  ;;  %v1065_v24 = vsel %vm269_vm5, %v2828_v46, %v1064_v35  ;;  %v1516_v46 = vsel %vm252_vm4, %v2814_v63, %v1515_v30 }
 0x1a9   : > { %v1533_v43 = vrot.slane %v2847_v9, 4  ;;  %v1478_v1 = vadd.f32 %v1476_v22, %v1458_v48  ;;  %v1067_v0 = vadd.f32 %v1065_v24, %v1047_v18 }
 0x1ab   : > { %v2866_v38 = vpop.permute.xlu1 %1080  ;;  %v1535_v27 = vsel %vm216_vm0, %v1533_v43, %v1534_v31  ;;  %v1625_v43 = vsub.s32 0, %v1624_v33 }
 0x1ac   : > { %v2868_v61 = vpop.permute.xlu0 %1078  ;;  %v1083_v32 = vrot.slane %v2866_v38, 4  ;;  %v1496_v38 = vsel %vm235_vm3, %v2784_v54, %v1495_v29  ;;  %v1536_v10 = vsel %vm269_vm5, %v2847_v9, %v1535_v27  ;;  %v678_v9 = vstv %s2924_s17 }
 0x1ad   : > { %v1082_v53 = vrot.slane %v2868_v61, 4  ;;  %v679_v59 = vadd.f32 %v678_v9, %v676_v44 }
 0x1af   : > { %v2883_v45 = vpop.permute.xlu1 %1551  ;;  %v1084_v8 = vsel %vm216_vm0, %v1082_v53, %v1083_v32  ;;  %v1629_v53 = vsub.s32 4, %v1624_v33  ;;  %v1626_v27 = vrot.slane %v679_v59, %v1625_v43 }
 0x1b0   : > { %v2885_v36 = vpop.permute.xlu0 %1549  ;;  %v1554_v58 = vrot.slane %v2883_v45, 4  ;;  %v1498_v45 = vadd.f32 %v1496_v38, %v1478_v1  ;;  %v1085_v19 = vsel %vm286_vm6, %v2868_v61, %v1084_v8  ;;  %v1620_v8 = vstv %s2960_s21 }
 0x1b1   : > { %v1553_v54 = vrot.slane %v2885_v36, 4  ;;  %v1087_v55 = vadd.f32 %v1085_v19, %v1067_v0 }
 0x1b2   : > { %v1518_v25 = vadd.f32 %v1516_v46, %v1498_v45 }
 0x1b3   : > { %v1101_v21 = vpop.permute.xlu1 %1100  ;;  %v1555_v52 = vsel %vm216_vm0, %v1553_v54, %v1554_v58 }
 0x1b4   : > { %v2902_v49 = vpop.permute.xlu0 %1098  ;;  %v1103_v26 = vrot.slane %v1101_v21, 4  ;;  %v1538_v15 = vadd.f32 %v1536_v10, %v1518_v25  ;;  %v1556_v41 = vsel %vm286_vm6, %v2885_v36, %v1555_v52 }
 0x1b5   : > { %v1102_v7 = vrot.slane %v2902_v49, 4 }
 0x1b7   : > { %v1572_v39 = vpop.permute.xlu1 %1571  ;;  %v1104_v6 = vsel %vm216_vm0, %v1102_v7, %v1103_v26 }
 0x1b8   : > { %v1570_v17 = vpop.permute.xlu0 %1569  ;;  %v1574_v11 = vrot.slane %v1572_v39, 4  ;;  %v1105_v60 = vsel %vm303_vm7, %v2902_v49, %v1104_v6  ;;  %v1558_v39 = vadd.f32 %v1556_v41, %v1538_v15 }
 0x1b9   : > { %v1573_v42 = vrot.slane %v1570_v17, 4  ;;  %v1107_v23 = vadd.f32 %v1105_v60, %v1087_v55 }
 0x1bb   : > { %v1121_v16 = vpop.permute.xlu1 %1120  ;;  %v1575_v61 = vsel %vm216_vm0, %v1573_v42, %v1574_v11 }
 0x1bc   : > { %v1119_v50 = vpop.permute.xlu0 %1118  ;;  %v1123_v62 = vrot.slane %v1121_v16, 4  ;;  %v1576_v32 = vsel %vm303_vm7, %v1570_v17, %v1575_v61 }
 0x1bd   : > { %v1122_v47 = vrot.slane %v1119_v50, 4  ;;  %v1578_v38 = vadd.f32 %v1576_v32, %v1558_v39 }
 0x1bf   : > { %v1592_v56 = vpop.permute.xlu1 %1591  ;;  %v1124_v63 = vsel %vm216_vm0, %v1122_v47, %v1123_v62 }
 0x1c0   : > { %v1590_v34 = vpop.permute.xlu0 %1589  ;;  %v1594_v3 = vrot.slane %v1592_v56, 4  ;;  %v1125_v40 = vsel %vm320_vm8, %v1119_v50, %v1124_v63  ;;  %v1630_v50 = vrot.slane %v679_v59, %v1629_v53 }
 0x1c1   : > { %v1593_v21 = vrot.slane %v1590_v34, 4  ;;  %v1127_v5 = vadd.f32 %v1125_v40, %v1107_v23 }
 0x1c3   : > { %v1141_v29 = vpop.permute.xlu1 %1140  ;;  %v1595_v49 = vsel %vm216_vm0, %v1593_v21, %v1594_v3 }
 0x1c4   : > { %v1139_v51 = vpop.permute.xlu0 %1138  ;;  %v1143_v28 = vrot.slane %v1141_v29, 4  ;;  %v1596_v35 = vsel %vm320_vm8, %v1590_v34, %v1595_v49 }
 0x1c5   : > { %v1142_v31 = vrot.slane %v1139_v51, 4  ;;  %v1598_v17 = vadd.f32 %v1596_v35, %v1578_v38 }
 0x1c7   : > { %v1144_v36 = vsel %vm216_vm0, %v1142_v31, %v1143_v28  ;;  %v1612_v48 = vpop.permute.xlu1 %1611 }
 0x1c8   : > { %v1145_v57 = vsel %vm337_vm1, %v1139_v51, %v1144_v36  ;;  %v1610_v22 = vpop.permute.xlu0 %1609  ;;  %v1614_v26 = vrot.slane %v1612_v48, 4 }
 0x1c9   : > { %v1147_v2 = vadd.f32 %v1145_v57, %v1127_v5  ;;  %v1613_v7 = vrot.slane %v1610_v22, 4 }
 0x1cb   : > { %v1150_v30 = vadd.f32 %v1149_v20, %v1147_v2  ;;  %v1615_v24 = vsel %vm216_vm0, %v1613_v7, %v1614_v26 }
 0x1cc   : > { %v1616_v16 = vsel %vm337_vm1, %v1610_v22, %v1615_v24 }
 0x1cd   : > { %v1637_v58 = vrot.slane %v1150_v30, %v1625_v43  ;;  %v1641_v54 = vrot.slane %v1150_v30, %v1629_v53  ;;  %v1618_v62 = vadd.f32 %v1616_v16, %v1598_v17 }
 0x1cf   : > { %v1656_v47 = vsel %vm1655_vm9, %v1626_v27, %v1637_v58  ;;  %v1657_v37 = vsel %vm1655_vm9, %v1630_v50, %v1641_v54  ;;  %v1621_v13 = vadd.f32 %v1620_v8, %v1618_v62 }
 0x1d1   : > { %v1648_v1 = vrot.slane %v1621_v13, %v1625_v43  ;;  %v1652_v14 = vrot.slane %v1621_v13, %v1629_v53 }
 0x1d3   : > { %v1659_v18 = vsel %vm1658_vm10, %v1656_v47, %v1648_v1  ;;  %v1660_v46 = vsel %vm1658_vm10, %v1657_v37, %v1652_v14 }
 0x1d4   : > { %v1663_v6 = vcombine.low %v1659_v18, %v1660_v46 }
 0x1d6   : > { %1665 = vst [vmem:[%s197_s27] sm:$0x77] %v1663_v6 }
 0x1d7 PF: > { %s15_s12 = sadd.s32 1, %s2026_s12  }
 0x1d8   : > { %p12_p5 = scmp.ge.s32.totalorder %s15_s12, 4  }
 0x1da   :  { %14 = sbr.rel (!%p12_p5) target bundleno = 2 (0x2), region = 71 }
 0x1df   :  { %1687 = vsyncpa [#allocation3], 1 }
 0x1e0   :  { %1689 = vsyncpa [#allocation3 + $0x1], 1 }
 0x1e1   :  { %1690 = vsyncpa [#allocation5], 1 }

</bundles_post_ra>
